<compile_context>
chip_gen: v7x
topology: tpu7x:2x2x1
jax: 0.10.0
libtpu: 0.0.40
codegen_flags: <defaults>
</compile_context>

<pallas_src>
import jax
import jax.numpy as jnp
from jax.experimental import pallas as pl
from jax.experimental.pallas import tpu as pltpu

EPS = 1e-5     # torch BatchNorm1d default eps
LANE = 128     # lane-dense channel padding


def _round_up(v, m):
    return (v + m - 1) // m * m


def _pad2(a, rows, cols):
    return jnp.zeros((rows, cols), a.dtype).at[: a.shape[0], : a.shape[1]].set(a)


def _pad1(a, n):
    return jnp.zeros((n,), a.dtype).at[: a.shape[0]].set(a)


def _nbytes(shape, itemsize, nbuf=1):
    total = itemsize * nbuf
    for s in shape:
        total *= s
    return total


_BUFFERED = getattr(pl, "Buffered", None)


def _invariant_spec(shape, index_map, single_buffer):
    """BlockSpec for a grid-invariant operand; single-buffered when supported."""
    if single_buffer and _BUFFERED is not None:
        try:
            return pl.BlockSpec(shape, index_map, pipeline_mode=_BUFFERED(1))
        except TypeError:
            pass
    return pl.BlockSpec(shape, index_map)


# ---------------------------------------------------------------------------
# Single fused kernel. grid = (num_conv_layers,).
#   l == 0 prologue : DMA x0 (HBM->h_scr), h = relu( bn_feat(x) @ W_feat )      (gfn: no A, no bias)
#   every l         : h = relu( A_hat @ (bn_conv_l(h) @ W_l) + b_l )            (GCNConv)
#   l == last       : hg = P @ h ; fc: hg = relu(bn_fc(hg)@W_fc + b_fc) ;
#                     out = log_softmax( bn_hidden(hg) @ W_class + b_class )
# Node features h stay resident in a VMEM scratch across all grid steps; only the (G, K)
# log-probs go back to HBM.
# ---------------------------------------------------------------------------
def _make_resgcn_kernel(num_fc, k, cin_pad, c, c_scr):
    def kernel(x0_hbm, a_ref, featp_ref, wfeat_ref, convp_ref, convw_ref,
               pool_ref, epi_ref, wfc_ref, wc_ref, o_ref, h_scr, dma_sem):
        l = pl.program_id(0)
        last = pl.num_programs(0) - 1

        def bn(v, gamma, beta):
            # BatchNorm1d, training-mode batch statistics, one-pass: var = E[x^2] - mean^2.
            # Invariant: padded channels have gamma = beta = 0, so they stay exactly 0 through
            # BN / matmul / ReLU.  Reductions MUST stay f32 and no padded *rows* may enter the
            # statistics (none do: N and G are unpadded here).
            m = jnp.mean(v, axis=0, keepdims=True)
            ex2 = jnp.mean(v * v, axis=0, keepdims=True)
            var = jnp.maximum(ex2 - m * m, 0.0)
            return (v - m) * jax.lax.rsqrt(var + EPS) * gamma + beta

        def h_view():           # (n, c) view of the resident node features
            return h_scr[...] if c == c_scr else h_scr[:, pl.ds(0, c)]

        def h_store(v):
            if c == c_scr:
                h_scr[...] = v
            else:
                h_scr[:, pl.ds(0, c)] = v

        @pl.when(l == 0)
        def _():
            # One-shot DMA of the padded node features into the resident scratch, then the
            # gfn feature layer: h = relu( bn_feat(x) @ W_feat )   (no propagation, no bias).
            dst = h_scr if cin_pad == c_scr else h_scr.at[:, pl.ds(0, cin_pad)]
            cp = pltpu.make_async_copy(x0_hbm, dst, dma_sem)
            cp.start()
            cp.wait()
            featp = featp_ref[...]                                   # (2, cin_pad)
            xin = h_scr[...] if cin_pad == c_scr else h_scr[:, pl.ds(0, cin_pad)]
            xn = bn(xin, featp[0:1, :], featp[1:2, :])
            xw = jnp.dot(xn.astype(jnp.bfloat16), wfeat_ref[...],
                         preferred_element_type=jnp.float32)
            h_store(jnp.maximum(xw, 0.0))

        # GCNConv layer l:  h = relu( A_hat @ (bn(h) @ W_l) + b_l )
        p = convp_ref[...]                                            # (1, 3, c)
        gamma, beta, bias = p[0, 0:1, :], p[0, 1:2, :], p[0, 2:3, :]
        hn = bn(h_view(), gamma, beta)
        hw = jnp.dot(hn.astype(jnp.bfloat16), convw_ref[0],
                     preferred_element_type=jnp.float32)
        agg = jnp.dot(a_ref[...], hw.astype(jnp.bfloat16),
                      preferred_element_type=jnp.float32) + bias
        h_store(jnp.maximum(agg, 0.0))

        @pl.when(l == last)
        def _():
            # Fused epilogue on tiny (G, c) data: pool -> FC stack -> bn_hidden -> classifier.
            ep = epi_ref[...]                                         # (3*num_fc + 3, c)
            hg = jnp.dot(pool_ref[...], h_view().astype(jnp.bfloat16),
                         preferred_element_type=jnp.float32)          # global_add_pool
            for i in range(num_fc):                                   # bns_fc[i] -> lins[i] -> relu
                z = bn(hg, ep[3 * i:3 * i + 1, :], ep[3 * i + 1:3 * i + 2, :])
                hg = jnp.maximum(
                    jnp.dot(z.astype(jnp.bfloat16), wfc_ref[i],
                            preferred_element_type=jnp.float32) + ep[3 * i + 2:3 * i + 3, :],
                    0.0)
            z = bn(hg, ep[3 * num_fc:3 * num_fc + 1, :],
                   ep[3 * num_fc + 1:3 * num_fc + 2, :])              # bn_hidden
            logits = jnp.dot(z.astype(jnp.bfloat16), wc_ref[...],
                             preferred_element_type=jnp.float32) \
                + ep[3 * num_fc + 2:3 * num_fc + 3, :k]               # lin_class
            m = jnp.max(logits, axis=-1, keepdims=True)
            s = logits - m
            o_ref[...] = s - jnp.log(jnp.sum(jnp.exp(s), axis=-1, keepdims=True))

    return kernel


# ---------------------------------------------------------------------------
# Parameter construction (mirrors ResGCN.__init__ with res_branch='BNConvReLU', collapse=False,
# gfn=False, global_pool='sum', num_conv_layers=3, num_fc_layers=2, no xg, no gating).
# BN init: weight=1, bias=1e-4 (constant_ init in the PyTorch code).
# ---------------------------------------------------------------------------
def init_params(key, hidden_in, hidden, num_classes, num_conv_layers=3):
    keys = jax.random.split(key, 8)

    def glorot(kk, shape):
        lim = (6.0 / (shape[0] + shape[1])) ** 0.5
        return jax.random.uniform(kk, shape, jnp.float32, -lim, lim)

    bn = lambda d: (jnp.ones((d,), jnp.float32), jnp.full((d,), 1e-4, jnp.float32))
    p = {}
    p["bn_feat"] = bn(hidden_in)
    p["conv_feat_w"] = glorot(keys[0], (hidden_in, hidden))           # GCNConv(gfn): x @ W only
    p["bns_conv"] = [bn(hidden) for _ in range(num_conv_layers)]
    p["convs"] = [(glorot(keys[1 + i], (hidden, hidden)),
                   jnp.zeros((hidden,), jnp.float32)) for i in range(num_conv_layers)]
    p["bns_fc"] = [bn(hidden)]                                        # num_fc_layers - 1 = 1
    p["lins"] = [(glorot(keys[5], (hidden, hidden)), jnp.zeros((hidden,), jnp.float32))]
    p["bn_hidden"] = bn(hidden)
    p["lin_class"] = (glorot(keys[6], (hidden, num_classes)),
                      jnp.zeros((num_classes,), jnp.float32))
    return p


# ---------------------------------------------------------------------------
# forward_BNConvReLU (conv_residual=False, fc_residual=False, dropout=0, xg=None)
# Training-mode BN (batch statistics), as in the training forward path.
# NOTE: BatchNorm1dSafe's single-row bypass is not needed here (N and G > 1, static shapes).
# ---------------------------------------------------------------------------
def resgcn_forward(params, x, a_norm, pool_mat, num_node_labels):
    x = x[:, num_node_labels:]                        # drop node-label columns
    n, cin = x.shape
    g = pool_mat.shape[0]
    hidden = params["conv_feat_w"].shape[1]
    k = params["lin_class"][0].shape[1]
    num_conv = len(params["convs"])
    num_fc = len(params["lins"])
    c = _round_up(hidden, LANE)                       # lane-dense conv channel width
    cin_pad = _round_up(cin, LANE)                    # lane-dense input channel width
    c_scr = max(c, cin_pad)                           # resident h scratch width
    assert k <= c, "num_classes must fit in the padded channel width"
    f32, bf16 = jnp.float32, jnp.bfloat16

    # --- feature (gfn) layer: its own weight, not padded into the streamed conv stack ---
    g_feat, b_feat = params["bn_feat"]
    featp = jnp.stack([_pad1(g_feat, cin_pad), _pad1(b_feat, cin_pad)])          # (2, cin_pad)
    wfeat = _pad2(params["conv_feat_w"], cin_pad, c).astype(bf16)                # (cin_pad, c)

    # --- per-layer conv parameters, fused into two streamed tensors ---
    convp = jnp.stack([jnp.stack([_pad1(gm, c), _pad1(bt, c), _pad1(b, c)])
                       for (gm, bt), (_, b) in zip(params["bns_conv"], params["convs"])])
    convw = jnp.stack([_pad2(w, c, c) for w, _ in params["convs"]]).astype(bf16)

    # --- packed epilogue parameters: [gfc_i, bfc_i, bias_i]*num_fc, gh, bh, bias_class ---
    epi_rows = []
    for (gm, bt), (_, b) in zip(params["bns_fc"], params["lins"]):
        epi_rows += [_pad1(gm, c), _pad1(bt, c), _pad1(b, c)]
    gh, bh = params["bn_hidden"]
    epi_rows += [_pad1(gh, c), _pad1(bh, c), _pad1(params["lin_class"][1], c)]
    epi = jnp.stack(epi_rows)                                                    # (3*num_fc+3, c)
    wfc = jnp.stack([_pad2(w, c, c) for w, _ in params["lins"]]).astype(bf16)    # (num_fc, c, c)
    wc = _pad2(params["lin_class"][0], c, k).astype(bf16)                        # (c, k)

    x0 = _pad2(x.astype(f32), n, cin_pad)             # HBM-resident, DMA'd once at l==0
    a_bf = a_norm.astype(bf16)                        # MXU operand; halves A's HBM/VMEM bytes
    pool_bf = pool_mat.astype(bf16)                   # 0/1 exactly representable

    # --- derived VMEM budget (resident + streamed x2 + scratch + elementwise temps) ---
    resident = (_nbytes((n, n), 2) + _nbytes((2, cin_pad), 4) + _nbytes((cin_pad, c), 2)
                + _nbytes((g, n), 2) + _nbytes((3 * num_fc + 3, c), 4)
                + _nbytes((num_fc, c, c), 2) + _nbytes((c, k), 2)
                + _nbytes((1, 3, c), 4, 2) + _nbytes((1, c, c), 2, 2)
                + _nbytes((g, k), 4, 2) + _nbytes((n, c_scr), 4))
    temps = 6 * n * c_scr * 4
    try:
        phys_vmem = int(pltpu.get_tpu_info().vmem_capacity_bytes)
    except Exception:
        phys_vmem = 64 * 1024 * 1024                  # safe default (v7x has the smallest VMEM)
    vmem_limit = min(max(int((resident + temps) * 1.5) + (4 << 20), 32 << 20),
                     int(phys_vmem * 0.85))

    flops = (2 * n * cin_pad * c
             + num_conv * (2 * n * c * c + 2 * n * n * c)
             + 2 * g * n * c + num_fc * 2 * g * c * c + 2 * g * c * k)
    bytes_accessed = (x0.size * 4 + a_bf.size * 2 + featp.size * 4 + wfeat.size * 2
                      + convp.size * 4 + convw.size * 2 + pool_bf.size * 2
                      + epi.size * 4 + wfc.size * 2 + wc.size * 2 + g * k * 4)
    cost = pl.CostEstimate(flops=int(flops),
                           transcendentals=int((2 + num_conv + num_fc) * c + g * (k + 1)),
                           bytes_accessed=int(bytes_accessed))

    def run(single_buffer):
        def inv(shape, imap):
            return _invariant_spec(shape, imap, single_buffer)

        grid_spec = pltpu.PrefetchScalarGridSpec(
            num_scalar_prefetch=0,
            grid=(num_conv,),
            in_specs=[
                pl.BlockSpec(memory_space=pl.ANY),               # x0: stays in HBM, DMA'd once
                inv((n, n), lambda l: (0, 0)),                   # A_hat (bf16), resident
                inv((2, cin_pad), lambda l: (0, 0)),             # bn_feat gamma/beta
                inv((cin_pad, c), lambda l: (0, 0)),             # W_feat (bf16)
                pl.BlockSpec((1, 3, c), lambda l: (l, 0, 0)),    # per-layer gamma/beta/bias (streamed)
                pl.BlockSpec((1, c, c), lambda l: (l, 0, 0)),    # per-layer conv weight (bf16, streamed)
                inv((g, n), lambda l: (0, 0)),                   # pooling matrix (bf16)
                inv((3 * num_fc + 3, c), lambda l: (0, 0)),      # packed epilogue BN/bias params
                inv((num_fc, c, c), lambda l: (0, 0, 0)),        # FC weights (bf16)
                inv((c, k), lambda l: (0, 0)),                   # class weight (bf16)
            ],
            out_specs=pl.BlockSpec((g, k), lambda l: (0, 0)),
            scratch_shapes=[pltpu.VMEM((n, c_scr), jnp.float32),  # resident node features h
                            pltpu.SemaphoreType.DMA(())],         # x0 one-shot DMA
        )
        return pl.pallas_call(
            _make_resgcn_kernel(num_fc, k, cin_pad, c, c_scr),
            out_shape=jax.ShapeDtypeStruct((g, k), f32),
            grid_spec=grid_spec,
            compiler_params=pltpu.CompilerParams(
                dimension_semantics=("arbitrary",),               # layers are sequential
                vmem_limit_bytes=vmem_limit),
            cost_estimate=cost,
        )(x0, a_bf, featp, wfeat, convp, convw, pool_bf, epi, wfc, wc)

    try:
        return run(True)
    except Exception:
        # Fallback for jax versions without single-buffer pipeline_mode support.
        return run(False)


# ---------------------------------------------------------------------------
# Pure-JAX f32 reference (mirrors forward_BNConvReLU) for a correctness check.
# ---------------------------------------------------------------------------
def resgcn_reference(params, x, a_norm, pool_mat, num_node_labels):
    x = x[:, num_node_labels:]

    def bn(v, gb):
        gm, bt = gb
        m = v.mean(0, keepdims=True)
        var = ((v - m) ** 2).mean(0, keepdims=True)
        return (v - m) / jnp.sqrt(var + EPS) * gm + bt

    h = bn(x, params["bn_feat"])
    h = jnp.maximum(h @ params["conv_feat_w"], 0.0)
    for i, (w, b) in enumerate(params["convs"]):
        z = bn(h, params["bns_conv"][i])
        h = jnp.maximum(a_norm @ (z @ w) + b, 0.0)
    hg = pool_mat @ h
    for i, (w, b) in enumerate(params["lins"]):
        z = bn(hg, params["bns_fc"][i])
        hg = jnp.maximum(z @ w + b, 0.0)
    z = bn(hg, params["bn_hidden"])
    logits = z @ params["lin_class"][0] + params["lin_class"][1]
    return jax.nn.log_softmax(logits, axis=-1)


if __name__ == "__main__":
    # Small synthetic graph batch: 2 graphs of 8 nodes each (ring graphs).
    N, G = 16, 2
    num_features, num_node_labels = 10, 2
    hidden_in = num_features - num_node_labels                    # 8
    hidden, num_classes = 32, 4

    key = jax.random.PRNGKey(0)
    kx, kparam = jax.random.split(key)
    x = jax.random.normal(kx, (N, num_features), jnp.float32)
    batch = jnp.array([0] * 8 + [1] * 8, jnp.int32)

    # undirected ring edges within each graph
    src, dst = [], []
    for gph in range(G):
        base = gph * 8
        for i in range(8):
            j = (i + 1) % 8
            src += [base + i, base + j]
            dst += [base + j, base + i]
    edge_index = jnp.array([src, dst], jnp.int32)

    # Dense symmetric-normalized adjacency with self loops (PyG GCNConv norm):
    # A_hat = D^{-1/2} (A + I) D^{-1/2}
    A = jnp.zeros((N, N), jnp.float32).at[edge_index[1], edge_index[0]].add(1.0)
    A = A + jnp.eye(N, dtype=jnp.float32)
    deg = A.sum(axis=1)
    dinv = jax.lax.rsqrt(deg)
    a_norm = dinv[:, None] * A * dinv[None, :]

    # One-hot pooling matrix for global_add_pool
    pool_mat = (batch[None, :] == jnp.arange(G)[:, None]).astype(jnp.float32)

    params = init_params(kparam, hidden_in, hidden, num_classes)

    out = resgcn_forward(params, x, a_norm, pool_mat, num_node_labels)
    out = jax.block_until_ready(out)
    assert out.shape == (G, num_classes)

    ref = resgcn_reference(params, x, a_norm, pool_mat, num_node_labels)
    err = float(jnp.max(jnp.abs(out - ref)))
    print(f"max |kernel - f32 reference| = {err:.4e}")
    assert err < 0.25, f"kernel diverges from f32 reference: {err}"   # bf16-MXU tolerance
    print("KERNEL_OK")
</pallas_src>

<mosaic_0001>
module attributes {stable_mosaic.version = 11 : i64} {
  func.func @kernel(%arg0: i32, %arg1: memref<16x128xf32, #tpu.memory_space<any>>, %arg2: memref<16x16xbf16, #tpu.memory_space<vmem>>, %arg3: memref<2x128xf32, #tpu.memory_space<vmem>>, %arg4: memref<128x128xbf16, #tpu.memory_space<vmem>>, %arg5: memref<1x3x128xf32, #tpu.memory_space<vmem>>, %arg6: memref<1x128x128xbf16, #tpu.memory_space<vmem>>, %arg7: memref<2x16xbf16, #tpu.memory_space<vmem>>, %arg8: memref<6x128xf32, #tpu.memory_space<vmem>>, %arg9: memref<1x128x128xbf16, #tpu.memory_space<vmem>>, %arg10: memref<128x4xbf16, #tpu.memory_space<vmem>>, %arg11: memref<2x4xf32, #tpu.memory_space<vmem>>, %arg12: memref<16x128xf32, #tpu.memory_space<vmem>>, %arg13: memref<!tpu.dma_semaphore, #tpu.memory_space<semaphore_mem>>) attributes {dimension_semantics = [#tpu.dimension_semantics<arbitrary>], iteration_bounds = array<i64: 3>, scalar_prefetch = 0 : i64, scratch_operands = 2 : i64, tpu.core_type = #tpu.core_type<tc>, window_params = [{}, {pipeline_mode = #tpu.pipeline_mode<synchronous>, transform_indices = @transform_1, window_bounds = array<i64: 16, 16>}, {pipeline_mode = #tpu.pipeline_mode<synchronous>, transform_indices = @transform_2, window_bounds = array<i64: 2, 128>}, {pipeline_mode = #tpu.pipeline_mode<synchronous>, transform_indices = @transform_3, window_bounds = array<i64: 128, 128>}, {transform_indices = @transform_4, window_bounds = array<i64: 1, 3, 128>}, {transform_indices = @transform_5, window_bounds = array<i64: 1, 128, 128>}, {pipeline_mode = #tpu.pipeline_mode<synchronous>, transform_indices = @transform_6, window_bounds = array<i64: 2, 16>}, {pipeline_mode = #tpu.pipeline_mode<synchronous>, transform_indices = @transform_7, window_bounds = array<i64: 6, 128>}, {pipeline_mode = #tpu.pipeline_mode<synchronous>, transform_indices = @transform_8, window_bounds = array<i64: 1, 128, 128>}, {pipeline_mode = #tpu.pipeline_mode<synchronous>, transform_indices = @transform_9, window_bounds = array<i64: 128, 4>}, {pipeline_mode = #tpu.pipeline_mode<synchronous>, transform_indices = @transform_10, window_bounds = array<i64: 2, 4>}]} {
    %c0_i32 = arith.constant 0 : i32
    %0 = arith.cmpi eq, %arg0, %c0_i32 : i32
    %1 = arith.extui %0 : i1 to i32
    %c0_i32_0 = arith.constant 0 : i32
    %2 = arith.cmpi ne, %1, %c0_i32_0 : i32
    scf.if %2 {
      tpu.enqueue_dma source(%arg1 : memref<16x128xf32, #tpu.memory_space<any>>) target(%arg12 : memref<16x128xf32, #tpu.memory_space<vmem>>) target_semaphore(%arg13 : memref<!tpu.dma_semaphore, #tpu.memory_space<semaphore_mem>>)
      tpu.wait_dma2 semaphore(%arg13 : memref<!tpu.dma_semaphore, #tpu.memory_space<semaphore_mem>>) src(%arg1 : memref<16x128xf32, #tpu.memory_space<any>>) dst(%arg12 : memref<16x128xf32, #tpu.memory_space<vmem>>)
      %c0_21 = arith.constant 0 : index
      %c0_22 = arith.constant 0 : index
      %50 = vector.load %arg3[%c0_21, %c0_22] : memref<2x128xf32, #tpu.memory_space<vmem>>, vector<2x128xf32>
      %c0_23 = arith.constant 0 : index
      %c0_24 = arith.constant 0 : index
      %51 = vector.load %arg12[%c0_23, %c0_24] : memref<16x128xf32, #tpu.memory_space<vmem>>, vector<16x128xf32>
      %52 = vector.extract_strided_slice %50 {offsets = [0, 0], sizes = [1, 128], strides = [1, 1]} : vector<2x128xf32> to vector<1x128xf32>
      %53 = vector.extract_strided_slice %50 {offsets = [1, 0], sizes = [1, 128], strides = [1, 1]} : vector<2x128xf32> to vector<1x128xf32>
      %cst_25 = arith.constant dense<0.000000e+00> : vector<128xf32>
      %54 = vector.multi_reduction <add>, %51, %cst_25 [0] : vector<16x128xf32> to vector<128xf32>
      %55 = vector.shape_cast %54 : vector<128xf32> to vector<1x128xf32>
      %cst_26 = arith.constant 1.600000e+01 : f32
      %56 = vector.broadcast %cst_26 : f32 to vector<1x128xf32>
      %57 = arith.divf %55, %56 : vector<1x128xf32>
      %58 = arith.mulf %51, %51 : vector<16x128xf32>
      %cst_27 = arith.constant dense<0.000000e+00> : vector<128xf32>
      %59 = vector.multi_reduction <add>, %58, %cst_27 [0] : vector<16x128xf32> to vector<128xf32>
      %60 = vector.shape_cast %59 : vector<128xf32> to vector<1x128xf32>
      %cst_28 = arith.constant 1.600000e+01 : f32
      %61 = vector.broadcast %cst_28 : f32 to vector<1x128xf32>
      %62 = arith.divf %60, %61 : vector<1x128xf32>
      %63 = arith.mulf %57, %57 : vector<1x128xf32>
      %64 = arith.subf %62, %63 : vector<1x128xf32>
      %cst_29 = arith.constant 0.000000e+00 : f32
      %65 = vector.broadcast %cst_29 : f32 to vector<1x128xf32>
      %66 = arith.maximumf %64, %65 : vector<1x128xf32>
      %67 = vector.broadcast %57 : vector<1x128xf32> to vector<16x128xf32>
      %68 = arith.subf %51, %67 : vector<16x128xf32>
      %cst_30 = arith.constant 9.99999974E-6 : f32
      %69 = vector.broadcast %cst_30 : f32 to vector<1x128xf32>
      %70 = arith.addf %66, %69 : vector<1x128xf32>
      %71 = math.rsqrt %70 : vector<1x128xf32>
      %72 = vector.broadcast %71 : vector<1x128xf32> to vector<16x128xf32>
      %73 = arith.mulf %68, %72 : vector<16x128xf32>
      %74 = vector.broadcast %52 : vector<1x128xf32> to vector<16x128xf32>
      %75 = arith.mulf %73, %74 : vector<16x128xf32>
      %76 = vector.broadcast %53 : vector<1x128xf32> to vector<16x128xf32>
      %77 = arith.addf %75, %76 : vector<16x128xf32>
      %78 = arith.truncf %77 : vector<16x128xf32> to vector<16x128xbf16>
      %c0_31 = arith.constant 0 : index
      %c0_32 = arith.constant 0 : index
      %79 = vector.load %arg4[%c0_31, %c0_32] : memref<128x128xbf16, #tpu.memory_space<vmem>>, vector<128x128xbf16>
      %cst_33 = arith.constant dense<0.000000e+00> : vector<16x128xf32>
      %80 = tpu.matmul %78, %79, %cst_33 {dimension_numbers = #tpu.dot_dimension_numbers<[1], [0], [0], [1], [0, 0, 1, 1], [], []>} : vector<16x128xbf16>, vector<128x128xbf16>, vector<16x128xf32> -> vector<16x128xf32>
      %cst_34 = arith.constant 0.000000e+00 : f32
      %81 = vector.broadcast %cst_34 : f32 to vector<16x128xf32>
      %82 = arith.maximumf %80, %81 : vector<16x128xf32>
      %c0_35 = arith.constant 0 : index
      %c0_36 = arith.constant 0 : index
      %83 = vector.load %arg12[%c0_35, %c0_36] : memref<16x128xf32, #tpu.memory_space<vmem>>, vector<16x128xf32>
      tpu.vector_store %arg12[%c0_35, %c0_36], %82 {strides = array<i32>} : memref<16x128xf32, #tpu.memory_space<vmem>>, vector<16x128xf32>,
    } else {
    }
    %c0 = arith.constant 0 : index
    %c0_1 = arith.constant 0 : index
    %c0_2 = arith.constant 0 : index
    %3 = vector.load %arg5[%c0, %c0_1, %c0_2] : memref<1x3x128xf32, #tpu.memory_space<vmem>>, vector<1x3x128xf32>
    %4 = vector.extract_strided_slice %3 {offsets = [0, 0, 0], sizes = [1, 1, 128], strides = [1, 1, 1]} : vector<1x3x128xf32> to vector<1x1x128xf32>
    %5 = vector.shape_cast %4 : vector<1x1x128xf32> to vector<1x128xf32>
    %6 = vector.extract_strided_slice %3 {offsets = [0, 1, 0], sizes = [1, 1, 128], strides = [1, 1, 1]} : vector<1x3x128xf32> to vector<1x1x128xf32>
    %7 = vector.shape_cast %6 : vector<1x1x128xf32> to vector<1x128xf32>
    %8 = vector.extract_strided_slice %3 {offsets = [0, 2, 0], sizes = [1, 1, 128], strides = [1, 1, 1]} : vector<1x3x128xf32> to vector<1x1x128xf32>
    %9 = vector.shape_cast %8 : vector<1x1x128xf32> to vector<1x128xf32>
    %c0_3 = arith.constant 0 : index
    %c0_4 = arith.constant 0 : index
    %10 = vector.load %arg12[%c0_3, %c0_4] : memref<16x128xf32, #tpu.memory_space<vmem>>, vector<16x128xf32>
    %cst = arith.constant dense<0.000000e+00> : vector<128xf32>
    %11 = vector.multi_reduction <add>, %10, %cst [0] : vector<16x128xf32> to vector<128xf32>
    %12 = vector.shape_cast %11 : vector<128xf32> to vector<1x128xf32>
    %cst_5 = arith.constant 1.600000e+01 : f32
    %13 = vector.broadcast %cst_5 : f32 to vector<1x128xf32>
    %14 = arith.divf %12, %13 : vector<1x128xf32>
    %15 = arith.mulf %10, %10 : vector<16x128xf32>
    %cst_6 = arith.constant dense<0.000000e+00> : vector<128xf32>
    %16 = vector.multi_reduction <add>, %15, %cst_6 [0] : vector<16x128xf32> to vector<128xf32>
    %17 = vector.shape_cast %16 : vector<128xf32> to vector<1x128xf32>
    %cst_7 = arith.constant 1.600000e+01 : f32
    %18 = vector.broadcast %cst_7 : f32 to vector<1x128xf32>
    %19 = arith.divf %17, %18 : vector<1x128xf32>
    %20 = arith.mulf %14, %14 : vector<1x128xf32>
    %21 = arith.subf %19, %20 : vector<1x128xf32>
    %cst_8 = arith.constant 0.000000e+00 : f32
    %22 = vector.broadcast %cst_8 : f32 to vector<1x128xf32>
    %23 = arith.maximumf %21, %22 : vector<1x128xf32>
    %24 = vector.broadcast %14 : vector<1x128xf32> to vector<16x128xf32>
    %25 = arith.subf %10, %24 : vector<16x128xf32>
    %cst_9 = arith.constant 9.99999974E-6 : f32
    %26 = vector.broadcast %cst_9 : f32 to vector<1x128xf32>
    %27 = arith.addf %23, %26 : vector<1x128xf32>
    %28 = math.rsqrt %27 : vector<1x128xf32>
    %29 = vector.broadcast %28 : vector<1x128xf32> to vector<16x128xf32>
    %30 = arith.mulf %25, %29 : vector<16x128xf32>
    %31 = vector.broadcast %5 : vector<1x128xf32> to vector<16x128xf32>
    %32 = arith.mulf %30, %31 : vector<16x128xf32>
    %33 = vector.broadcast %7 : vector<1x128xf32> to vector<16x128xf32>
    %34 = arith.addf %32, %33 : vector<16x128xf32>
    %35 = arith.truncf %34 : vector<16x128xf32> to vector<16x128xbf16>
    %c0_10 = arith.constant 0 : index
    %c0_11 = arith.constant 0 : index
    %c0_12 = arith.constant 0 : index
    %36 = vector.load %arg6[%c0_10, %c0_11, %c0_12] : memref<1x128x128xbf16, #tpu.memory_space<vmem>>, vector<1x128x128xbf16>
    %37 = vector.shape_cast %36 : vector<1x128x128xbf16> to vector<128x128xbf16>
    %cst_13 = arith.constant dense<0.000000e+00> : vector<16x128xf32>
    %38 = tpu.matmul %35, %37, %cst_13 {dimension_numbers = #tpu.dot_dimension_numbers<[1], [0], [0], [1], [0, 0, 1, 1], [], []>} : vector<16x128xbf16>, vector<128x128xbf16>, vector<16x128xf32> -> vector<16x128xf32>
    %c0_14 = arith.constant 0 : index
    %c0_15 = arith.constant 0 : index
    %39 = vector.load %arg2[%c0_14, %c0_15] : memref<16x16xbf16, #tpu.memory_space<vmem>>, vector<16x16xbf16>
    %40 = arith.truncf %38 : vector<16x128xf32> to vector<16x128xbf16>
    %cst_16 = arith.constant dense<0.000000e+00> : vector<16x128xf32>
    %41 = tpu.matmul %39, %40, %cst_16 {dimension_numbers = #tpu.dot_dimension_numbers<[1], [0], [0], [1], [0, 0, 1, 1], [], []>} : vector<16x16xbf16>, vector<16x128xbf16>, vector<16x128xf32> -> vector<16x128xf32>
    %42 = vector.broadcast %9 : vector<1x128xf32> to vector<16x128xf32>
    %43 = arith.addf %41, %42 : vector<16x128xf32>
    %cst_17 = arith.constant 0.000000e+00 : f32
    %44 = vector.broadcast %cst_17 : f32 to vector<16x128xf32>
    %45 = arith.maximumf %43, %44 : vector<16x128xf32>
    %c0_18 = arith.constant 0 : index
    %c0_19 = arith.constant 0 : index
    %46 = vector.load %arg12[%c0_18, %c0_19] : memref<16x128xf32, #tpu.memory_space<vmem>>, vector<16x128xf32>
    tpu.vector_store %arg12[%c0_18, %c0_19], %45 {strides = array<i32>} : memref<16x128xf32, #tpu.memory_space<vmem>>, vector<16x128xf32>,
    %c2_i32 = arith.constant 2 : i32
    %47 = arith.cmpi eq, %arg0, %c2_i32 : i32
    %48 = arith.extui %47 : i1 to i32
    %c0_i32_20 = arith.constant 0 : i32
    %49 = arith.cmpi ne, %48, %c0_i32_20 : i32
    scf.if %49 {
      %c0_21 = arith.constant 0 : index
      %c0_22 = arith.constant 0 : index
      %50 = vector.load %arg8[%c0_21, %c0_22] : memref<6x128xf32, #tpu.memory_space<vmem>>, vector<6x128xf32>
      %c0_23 = arith.constant 0 : index
      %c0_24 = arith.constant 0 : index
      %51 = vector.load %arg7[%c0_23, %c0_24] : memref<2x16xbf16, #tpu.memory_space<vmem>>, vector<2x16xbf16>
      %c0_25 = arith.constant 0 : index
      %c0_26 = arith.constant 0 : index
      %52 = vector.load %arg12[%c0_25, %c0_26] : memref<16x128xf32, #tpu.memory_space<vmem>>, vector<16x128xf32>
      %53 = arith.truncf %52 : vector<16x128xf32> to vector<16x128xbf16>
      %cst_27 = arith.constant dense<0.000000e+00> : vector<2x128xf32>
      %54 = tpu.matmul %51, %53, %cst_27 {dimension_numbers = #tpu.dot_dimension_numbers<[1], [0], [0], [1], [0, 0, 1, 1], [], []>} : vector<2x16xbf16>, vector<16x128xbf16>, vector<2x128xf32> -> vector<2x128xf32>
      %55 = vector.extract_strided_slice %50 {offsets = [0, 0], sizes = [1, 128], strides = [1, 1]} : vector<6x128xf32> to vector<1x128xf32>
      %56 = vector.extract_strided_slice %50 {offsets = [1, 0], sizes = [1, 128], strides = [1, 1]} : vector<6x128xf32> to vector<1x128xf32>
      %cst_28 = arith.constant dense<0.000000e+00> : vector<128xf32>
      %57 = vector.multi_reduction <add>, %54, %cst_28 [0] : vector<2x128xf32> to vector<128xf32>
      %58 = vector.shape_cast %57 : vector<128xf32> to vector<1x128xf32>
      %cst_29 = arith.constant 2.000000e+00 : f32
      %59 = vector.broadcast %cst_29 : f32 to vector<1x128xf32>
      %60 = arith.divf %58, %59 : vector<1x128xf32>
      %61 = arith.mulf %54, %54 : vector<2x128xf32>
      %cst_30 = arith.constant dense<0.000000e+00> : vector<128xf32>
      %62 = vector.multi_reduction <add>, %61, %cst_30 [0] : vector<2x128xf32> to vector<128xf32>
      %63 = vector.shape_cast %62 : vector<128xf32> to vector<1x128xf32>
      %cst_31 = arith.constant 2.000000e+00 : f32
      %64 = vector.broadcast %cst_31 : f32 to vector<1x128xf32>
      %65 = arith.divf %63, %64 : vector<1x128xf32>
      %66 = arith.mulf %60, %60 : vector<1x128xf32>
      %67 = arith.subf %65, %66 : vector<1x128xf32>
      %cst_32 = arith.constant 0.000000e+00 : f32
      %68 = vector.broadcast %cst_32 : f32 to vector<1x128xf32>
      %69 = arith.maximumf %67, %68 : vector<1x128xf32>
      %70 = vector.broadcast %60 : vector<1x128xf32> to vector<2x128xf32>
      %71 = arith.subf %54, %70 : vector<2x128xf32>
      %cst_33 = arith.constant 9.99999974E-6 : f32
      %72 = vector.broadcast %cst_33 : f32 to vector<1x128xf32>
      %73 = arith.addf %69, %72 : vector<1x128xf32>
      %74 = math.rsqrt %73 : vector<1x128xf32>
      %75 = vector.broadcast %74 : vector<1x128xf32> to vector<2x128xf32>
      %76 = arith.mulf %71, %75 : vector<2x128xf32>
      %77 = vector.broadcast %55 : vector<1x128xf32> to vector<2x128xf32>
      %78 = arith.mulf %76, %77 : vector<2x128xf32>
      %79 = vector.broadcast %56 : vector<1x128xf32> to vector<2x128xf32>
      %80 = arith.addf %78, %79 : vector<2x128xf32>
      %81 = arith.truncf %80 : vector<2x128xf32> to vector<2x128xbf16>
      %c0_34 = arith.constant 0 : index
      %c0_35 = arith.constant 0 : index
      %c0_36 = arith.constant 0 : index
      %82 = vector.load %arg9[%c0_34, %c0_35, %c0_36] : memref<1x128x128xbf16, #tpu.memory_space<vmem>>, vector<1x128x128xbf16>
      %83 = vector.shape_cast %82 : vector<1x128x128xbf16> to vector<128x128xbf16>
      %cst_37 = arith.constant dense<0.000000e+00> : vector<2x128xf32>
      %84 = tpu.matmul %81, %83, %cst_37 {dimension_numbers = #tpu.dot_dimension_numbers<[1], [0], [0], [1], [0, 0, 1, 1], [], []>} : vector<2x128xbf16>, vector<128x128xbf16>, vector<2x128xf32> -> vector<2x128xf32>
      %85 = vector.extract_strided_slice %50 {offsets = [2, 0], sizes = [1, 128], strides = [1, 1]} : vector<6x128xf32> to vector<1x128xf32>
      %86 = vector.broadcast %85 : vector<1x128xf32> to vector<2x128xf32>
      %87 = arith.addf %84, %86 : vector<2x128xf32>
      %cst_38 = arith.constant 0.000000e+00 : f32
      %88 = vector.broadcast %cst_38 : f32 to vector<2x128xf32>
      %89 = arith.maximumf %87, %88 : vector<2x128xf32>
      %90 = vector.extract_strided_slice %50 {offsets = [3, 0], sizes = [1, 128], strides = [1, 1]} : vector<6x128xf32> to vector<1x128xf32>
      %91 = vector.extract_strided_slice %50 {offsets = [4, 0], sizes = [1, 128], strides = [1, 1]} : vector<6x128xf32> to vector<1x128xf32>
      %cst_39 = arith.constant dense<0.000000e+00> : vector<128xf32>
      %92 = vector.multi_reduction <add>, %89, %cst_39 [0] : vector<2x128xf32> to vector<128xf32>
      %93 = vector.shape_cast %92 : vector<128xf32> to vector<1x128xf32>
      %cst_40 = arith.constant 2.000000e+00 : f32
      %94 = vector.broadcast %cst_40 : f32 to vector<1x128xf32>
      %95 = arith.divf %93, %94 : vector<1x128xf32>
      %96 = arith.mulf %89, %89 : vector<2x128xf32>
      %cst_41 = arith.constant dense<0.000000e+00> : vector<128xf32>
      %97 = vector.multi_reduction <add>, %96, %cst_41 [0] : vector<2x128xf32> to vector<128xf32>
      %98 = vector.shape_cast %97 : vector<128xf32> to vector<1x128xf32>
      %cst_42 = arith.constant 2.000000e+00 : f32
      %99 = vector.broadcast %cst_42 : f32 to vector<1x128xf32>
      %100 = arith.divf %98, %99 : vector<1x128xf32>
      %101 = arith.mulf %95, %95 : vector<1x128xf32>
      %102 = arith.subf %100, %101 : vector<1x128xf32>
      %cst_43 = arith.constant 0.000000e+00 : f32
      %103 = vector.broadcast %cst_43 : f32 to vector<1x128xf32>
      %104 = arith.maximumf %102, %103 : vector<1x128xf32>
      %105 = vector.broadcast %95 : vector<1x128xf32> to vector<2x128xf32>
      %106 = arith.subf %89, %105 : vector<2x128xf32>
      %cst_44 = arith.constant 9.99999974E-6 : f32
      %107 = vector.broadcast %cst_44 : f32 to vector<1x128xf32>
      %108 = arith.addf %104, %107 : vector<1x128xf32>
      %109 = math.rsqrt %108 : vector<1x128xf32>
      %110 = vector.broadcast %109 : vector<1x128xf32> to vector<2x128xf32>
      %111 = arith.mulf %106, %110 : vector<2x128xf32>
      %112 = vector.broadcast %90 : vector<1x128xf32> to vector<2x128xf32>
      %113 = arith.mulf %111, %112 : vector<2x128xf32>
      %114 = vector.broadcast %91 : vector<1x128xf32> to vector<2x128xf32>
      %115 = arith.addf %113, %114 : vector<2x128xf32>
      %116 = arith.truncf %115 : vector<2x128xf32> to vector<2x128xbf16>
      %c0_45 = arith.constant 0 : index
      %c0_46 = arith.constant 0 : index
      %117 = vector.load %arg10[%c0_45, %c0_46] : memref<128x4xbf16, #tpu.memory_space<vmem>>, vector<128x4xbf16>
      %cst_47 = arith.constant dense<0.000000e+00> : vector<2x4xf32>
      %118 = tpu.matmul %116, %117, %cst_47 {dimension_numbers = #tpu.dot_dimension_numbers<[1], [0], [0], [1], [0, 0, 1, 1], [], []>} : vector<2x128xbf16>, vector<128x4xbf16>, vector<2x4xf32> -> vector<2x4xf32>
      %119 = vector.extract_strided_slice %50 {offsets = [5, 0], sizes = [1, 4], strides = [1, 1]} : vector<6x128xf32> to vector<1x4xf32>
      %120 = vector.broadcast %119 : vector<1x4xf32> to vector<2x4xf32>
      %121 = arith.addf %118, %120 : vector<2x4xf32>
      %cst_48 = arith.constant dense<0xFF800000> : vector<2xf32>
      %122 = vector.multi_reduction <maximumf>, %121, %cst_48 [1] : vector<2x4xf32> to vector<2xf32>
      %123 = vector.shape_cast %122 : vector<2xf32> to vector<2x1xf32>
      %124 = vector.broadcast %123 : vector<2x1xf32> to vector<2x4xf32>
      %125 = arith.subf %121, %124 : vector<2x4xf32>
      %126 = math.exp %125 : vector<2x4xf32>
      %cst_49 = arith.constant dense<0.000000e+00> : vector<2xf32>
      %127 = vector.multi_reduction <add>, %126, %cst_49 [1] : vector<2x4xf32> to vector<2xf32>
      %128 = vector.shape_cast %127 : vector<2xf32> to vector<2x1xf32>
      %129 = math.log %128 : vector<2x1xf32>
      %130 = vector.broadcast %129 : vector<2x1xf32> to vector<2x4xf32>
      %131 = arith.subf %125, %130 : vector<2x4xf32>
      %c0_50 = arith.constant 0 : index
      %c0_51 = arith.constant 0 : index
      %132 = vector.load %arg11[%c0_50, %c0_51] : memref<2x4xf32, #tpu.memory_space<vmem>>, vector<2x4xf32>
      tpu.vector_store %arg11[%c0_50, %c0_51], %131 {strides = array<i32>} : memref<2x4xf32, #tpu.memory_space<vmem>>, vector<2x4xf32>,
    } else {
    }
    return
  }
  func.func @transform_1(%arg0: i32) -> (i32, i32) {
    %c0_i32 = arith.constant 0 : i32
    %c0_i32_0 = arith.constant 0 : i32
    %c0_i32_1 = arith.constant 0 : i32
    return %c0_i32, %c0_i32_0 : i32, i32
  }
  func.func @transform_2(%arg0: i32) -> (i32, i32) {
    %c0_i32 = arith.constant 0 : i32
    %c0_i32_0 = arith.constant 0 : i32
    %c0_i32_1 = arith.constant 0 : i32
    return %c0_i32, %c0_i32_0 : i32, i32
  }
  func.func @transform_3(%arg0: i32) -> (i32, i32) {
    %c0_i32 = arith.constant 0 : i32
    %c0_i32_0 = arith.constant 0 : i32
    %c0_i32_1 = arith.constant 0 : i32
    return %c0_i32, %c0_i32_0 : i32, i32
  }
  func.func @transform_4(%arg0: i32) -> (i32, i32, i32) {
    %c0_i32 = arith.constant 0 : i32
    %c0_i32_0 = arith.constant 0 : i32
    %c0_i32_1 = arith.constant 0 : i32
    return %arg0, %c0_i32, %c0_i32_0 : i32, i32, i32
  }
  func.func @transform_5(%arg0: i32) -> (i32, i32, i32) {
    %c0_i32 = arith.constant 0 : i32
    %c0_i32_0 = arith.constant 0 : i32
    %c0_i32_1 = arith.constant 0 : i32
    return %arg0, %c0_i32, %c0_i32_0 : i32, i32, i32
  }
  func.func @transform_6(%arg0: i32) -> (i32, i32) {
    %c0_i32 = arith.constant 0 : i32
    %c0_i32_0 = arith.constant 0 : i32
    %c0_i32_1 = arith.constant 0 : i32
    return %c0_i32, %c0_i32_0 : i32, i32
  }
  func.func @transform_7(%arg0: i32) -> (i32, i32) {
    %c0_i32 = arith.constant 0 : i32
    %c0_i32_0 = arith.constant 0 : i32
    %c0_i32_1 = arith.constant 0 : i32
    return %c0_i32, %c0_i32_0 : i32, i32
  }
  func.func @transform_8(%arg0: i32) -> (i32, i32, i32) {
    %c0_i32 = arith.constant 0 : i32
    %c0_i32_0 = arith.constant 0 : i32
    %c0_i32_1 = arith.constant 0 : i32
    %c0_i32_2 = arith.constant 0 : i32
    return %c0_i32, %c0_i32_0, %c0_i32_1 : i32, i32, i32
  }
  func.func @transform_9(%arg0: i32) -> (i32, i32) {
    %c0_i32 = arith.constant 0 : i32
    %c0_i32_0 = arith.constant 0 : i32
    %c0_i32_1 = arith.constant 0 : i32
    return %c0_i32, %c0_i32_0 : i32, i32
  }
  func.func @transform_10(%arg0: i32) -> (i32, i32) {
    %c0_i32 = arith.constant 0 : i32
    %c0_i32_0 = arith.constant 0 : i32
    %c0_i32_1 = arith.constant 0 : i32
    return %c0_i32, %c0_i32_0 : i32, i32
  }
}

module attributes {stable_mosaic.version = 11 : i64} {
  func.func @kernel(%arg0: i32, %arg1: memref<16x128xf32, #tpu.memory_space<any>>, %arg2: memref<16x16xbf16, #tpu.memory_space<vmem>>, %arg3: memref<2x128xf32, #tpu.memory_space<vmem>>, %arg4: memref<128x128xbf16, #tpu.memory_space<vmem>>, %arg5: memref<1x3x128xf32, #tpu.memory_space<vmem>>, %arg6: memref<1x128x128xbf16, #tpu.memory_space<vmem>>, %arg7: memref<2x16xbf16, #tpu.memory_space<vmem>>, %arg8: memref<6x128xf32, #tpu.memory_space<vmem>>, %arg9: memref<1x128x128xbf16, #tpu.memory_space<vmem>>, %arg10: memref<128x4xbf16, #tpu.memory_space<vmem>>, %arg11: memref<2x4xf32, #tpu.memory_space<vmem>>, %arg12: memref<16x128xf32, #tpu.memory_space<vmem>>, %arg13: memref<!tpu.dma_semaphore, #tpu.memory_space<semaphore_mem>>) attributes {dimension_semantics = [#tpu.dimension_semantics<arbitrary>], iteration_bounds = array<i64: 3>, scalar_prefetch = 0 : i64, scratch_operands = 2 : i64, tpu.core_type = #tpu.core_type<tc>, window_params = [{}, {pipeline_mode = #tpu.pipeline_mode<synchronous>, transform_indices = @transform_1, window_bounds = array<i64: 16, 16>}, {pipeline_mode = #tpu.pipeline_mode<synchronous>, transform_indices = @transform_2, window_bounds = array<i64: 2, 128>}, {pipeline_mode = #tpu.pipeline_mode<synchronous>, transform_indices = @transform_3, window_bounds = array<i64: 128, 128>}, {transform_indices = @transform_4, window_bounds = array<i64: 1, 3, 128>}, {transform_indices = @transform_5, window_bounds = array<i64: 1, 128, 128>}, {pipeline_mode = #tpu.pipeline_mode<synchronous>, transform_indices = @transform_6, window_bounds = array<i64: 2, 16>}, {pipeline_mode = #tpu.pipeline_mode<synchronous>, transform_indices = @transform_7, window_bounds = array<i64: 6, 128>}, {pipeline_mode = #tpu.pipeline_mode<synchronous>, transform_indices = @transform_8, window_bounds = array<i64: 1, 128, 128>}, {pipeline_mode = #tpu.pipeline_mode<synchronous>, transform_indices = @transform_9, window_bounds = array<i64: 128, 4>}, {pipeline_mode = #tpu.pipeline_mode<synchronous>, transform_indices = @transform_10, window_bounds = array<i64: 2, 4>}]} {
    %c0_i32 = arith.constant 0 : i32
    %0 = arith.cmpi eq, %arg0, %c0_i32 : i32
    %1 = arith.extui %0 : i1 to i32
    %c0_i32_0 = arith.constant 0 : i32
    %2 = arith.cmpi ne, %1, %c0_i32_0 : i32
    scf.if %2 {
      tpu.enqueue_dma source(%arg1 : memref<16x128xf32, #tpu.memory_space<any>>) target(%arg12 : memref<16x128xf32, #tpu.memory_space<vmem>>) target_semaphore(%arg13 : memref<!tpu.dma_semaphore, #tpu.memory_space<semaphore_mem>>)
      tpu.wait_dma2 semaphore(%arg13 : memref<!tpu.dma_semaphore, #tpu.memory_space<semaphore_mem>>) src(%arg1 : memref<16x128xf32, #tpu.memory_space<any>>) dst(%arg12 : memref<16x128xf32, #tpu.memory_space<vmem>>)
      %c0_21 = arith.constant 0 : index
      %c0_22 = arith.constant 0 : index
      %50 = vector.load %arg3[%c0_21, %c0_22] : memref<2x128xf32, #tpu.memory_space<vmem>>, vector<2x128xf32>
      %c0_23 = arith.constant 0 : index
      %c0_24 = arith.constant 0 : index
      %51 = vector.load %arg12[%c0_23, %c0_24] : memref<16x128xf32, #tpu.memory_space<vmem>>, vector<16x128xf32>
      %52 = vector.extract_strided_slice %50 {offsets = [0, 0], sizes = [1, 128], strides = [1, 1]} : vector<2x128xf32> to vector<1x128xf32>
      %53 = vector.extract_strided_slice %50 {offsets = [1, 0], sizes = [1, 128], strides = [1, 1]} : vector<2x128xf32> to vector<1x128xf32>
      %cst_25 = arith.constant dense<0.000000e+00> : vector<128xf32>
      %54 = vector.multi_reduction <add>, %51, %cst_25 [0] : vector<16x128xf32> to vector<128xf32>
      %55 = vector.shape_cast %54 : vector<128xf32> to vector<1x128xf32>
      %cst_26 = arith.constant 1.600000e+01 : f32
      %56 = vector.broadcast %cst_26 : f32 to vector<1x128xf32>
      %57 = arith.divf %55, %56 : vector<1x128xf32>
      %58 = arith.mulf %51, %51 : vector<16x128xf32>
      %cst_27 = arith.constant dense<0.000000e+00> : vector<128xf32>
      %59 = vector.multi_reduction <add>, %58, %cst_27 [0] : vector<16x128xf32> to vector<128xf32>
      %60 = vector.shape_cast %59 : vector<128xf32> to vector<1x128xf32>
      %cst_28 = arith.constant 1.600000e+01 : f32
      %61 = vector.broadcast %cst_28 : f32 to vector<1x128xf32>
      %62 = arith.divf %60, %61 : vector<1x128xf32>
      %63 = arith.mulf %57, %57 : vector<1x128xf32>
      %64 = arith.subf %62, %63 : vector<1x128xf32>
      %cst_29 = arith.constant 0.000000e+00 : f32
      %65 = vector.broadcast %cst_29 : f32 to vector<1x128xf32>
      %66 = arith.maximumf %64, %65 : vector<1x128xf32>
      %67 = vector.broadcast %57 : vector<1x128xf32> to vector<16x128xf32>
      %68 = arith.subf %51, %67 : vector<16x128xf32>
      %cst_30 = arith.constant 9.99999974E-6 : f32
      %69 = vector.broadcast %cst_30 : f32 to vector<1x128xf32>
      %70 = arith.addf %66, %69 : vector<1x128xf32>
      %71 = math.rsqrt %70 : vector<1x128xf32>
      %72 = vector.broadcast %71 : vector<1x128xf32> to vector<16x128xf32>
      %73 = arith.mulf %68, %72 : vector<16x128xf32>
      %74 = vector.broadcast %52 : vector<1x128xf32> to vector<16x128xf32>
      %75 = arith.mulf %73, %74 : vector<16x128xf32>
      %76 = vector.broadcast %53 : vector<1x128xf32> to vector<16x128xf32>
      %77 = arith.addf %75, %76 : vector<16x128xf32>
      %78 = arith.truncf %77 : vector<16x128xf32> to vector<16x128xbf16>
      %c0_31 = arith.constant 0 : index
      %c0_32 = arith.constant 0 : index
      %79 = vector.load %arg4[%c0_31, %c0_32] : memref<128x128xbf16, #tpu.memory_space<vmem>>, vector<128x128xbf16>
      %cst_33 = arith.constant dense<0.000000e+00> : vector<16x128xf32>
      %80 = tpu.matmul %78, %79, %cst_33 {dimension_numbers = #tpu.dot_dimension_numbers<[1], [0], [0], [1], [0, 0, 1, 1], [], []>} : vector<16x128xbf16>, vector<128x128xbf16>, vector<16x128xf32> -> vector<16x128xf32>
      %cst_34 = arith.constant 0.000000e+00 : f32
      %81 = vector.broadcast %cst_34 : f32 to vector<16x128xf32>
      %82 = arith.maximumf %80, %81 : vector<16x128xf32>
      %c0_35 = arith.constant 0 : index
      %c0_36 = arith.constant 0 : index
      %83 = vector.load %arg12[%c0_35, %c0_36] : memref<16x128xf32, #tpu.memory_space<vmem>>, vector<16x128xf32>
      tpu.vector_store %arg12[%c0_35, %c0_36], %82 {strides = array<i32>} : memref<16x128xf32, #tpu.memory_space<vmem>>, vector<16x128xf32>,
    } else {
    }
    %c0 = arith.constant 0 : index
    %c0_1 = arith.constant 0 : index
    %c0_2 = arith.constant 0 : index
    %3 = vector.load %arg5[%c0, %c0_1, %c0_2] : memref<1x3x128xf32, #tpu.memory_space<vmem>>, vector<1x3x128xf32>
    %4 = vector.extract_strided_slice %3 {offsets = [0, 0, 0], sizes = [1, 1, 128], strides = [1, 1, 1]} : vector<1x3x128xf32> to vector<1x1x128xf32>
    %5 = vector.shape_cast %4 : vector<1x1x128xf32> to vector<1x128xf32>
    %6 = vector.extract_strided_slice %3 {offsets = [0, 1, 0], sizes = [1, 1, 128], strides = [1, 1, 1]} : vector<1x3x128xf32> to vector<1x1x128xf32>
    %7 = vector.shape_cast %6 : vector<1x1x128xf32> to vector<1x128xf32>
    %8 = vector.extract_strided_slice %3 {offsets = [0, 2, 0], sizes = [1, 1, 128], strides = [1, 1, 1]} : vector<1x3x128xf32> to vector<1x1x128xf32>
    %9 = vector.shape_cast %8 : vector<1x1x128xf32> to vector<1x128xf32>
    %c0_3 = arith.constant 0 : index
    %c0_4 = arith.constant 0 : index
    %10 = vector.load %arg12[%c0_3, %c0_4] : memref<16x128xf32, #tpu.memory_space<vmem>>, vector<16x128xf32>
    %cst = arith.constant dense<0.000000e+00> : vector<128xf32>
    %11 = vector.multi_reduction <add>, %10, %cst [0] : vector<16x128xf32> to vector<128xf32>
    %12 = vector.shape_cast %11 : vector<128xf32> to vector<1x128xf32>
    %cst_5 = arith.constant 1.600000e+01 : f32
    %13 = vector.broadcast %cst_5 : f32 to vector<1x128xf32>
    %14 = arith.divf %12, %13 : vector<1x128xf32>
    %15 = arith.mulf %10, %10 : vector<16x128xf32>
    %cst_6 = arith.constant dense<0.000000e+00> : vector<128xf32>
    %16 = vector.multi_reduction <add>, %15, %cst_6 [0] : vector<16x128xf32> to vector<128xf32>
    %17 = vector.shape_cast %16 : vector<128xf32> to vector<1x128xf32>
    %cst_7 = arith.constant 1.600000e+01 : f32
    %18 = vector.broadcast %cst_7 : f32 to vector<1x128xf32>
    %19 = arith.divf %17, %18 : vector<1x128xf32>
    %20 = arith.mulf %14, %14 : vector<1x128xf32>
    %21 = arith.subf %19, %20 : vector<1x128xf32>
    %cst_8 = arith.constant 0.000000e+00 : f32
    %22 = vector.broadcast %cst_8 : f32 to vector<1x128xf32>
    %23 = arith.maximumf %21, %22 : vector<1x128xf32>
    %24 = vector.broadcast %14 : vector<1x128xf32> to vector<16x128xf32>
    %25 = arith.subf %10, %24 : vector<16x128xf32>
    %cst_9 = arith.constant 9.99999974E-6 : f32
    %26 = vector.broadcast %cst_9 : f32 to vector<1x128xf32>
    %27 = arith.addf %23, %26 : vector<1x128xf32>
    %28 = math.rsqrt %27 : vector<1x128xf32>
    %29 = vector.broadcast %28 : vector<1x128xf32> to vector<16x128xf32>
    %30 = arith.mulf %25, %29 : vector<16x128xf32>
    %31 = vector.broadcast %5 : vector<1x128xf32> to vector<16x128xf32>
    %32 = arith.mulf %30, %31 : vector<16x128xf32>
    %33 = vector.broadcast %7 : vector<1x128xf32> to vector<16x128xf32>
    %34 = arith.addf %32, %33 : vector<16x128xf32>
    %35 = arith.truncf %34 : vector<16x128xf32> to vector<16x128xbf16>
    %c0_10 = arith.constant 0 : index
    %c0_11 = arith.constant 0 : index
    %c0_12 = arith.constant 0 : index
    %36 = vector.load %arg6[%c0_10, %c0_11, %c0_12] : memref<1x128x128xbf16, #tpu.memory_space<vmem>>, vector<1x128x128xbf16>
    %37 = vector.shape_cast %36 : vector<1x128x128xbf16> to vector<128x128xbf16>
    %cst_13 = arith.constant dense<0.000000e+00> : vector<16x128xf32>
    %38 = tpu.matmul %35, %37, %cst_13 {dimension_numbers = #tpu.dot_dimension_numbers<[1], [0], [0], [1], [0, 0, 1, 1], [], []>} : vector<16x128xbf16>, vector<128x128xbf16>, vector<16x128xf32> -> vector<16x128xf32>
    %c0_14 = arith.constant 0 : index
    %c0_15 = arith.constant 0 : index
    %39 = vector.load %arg2[%c0_14, %c0_15] : memref<16x16xbf16, #tpu.memory_space<vmem>>, vector<16x16xbf16>
    %40 = arith.truncf %38 : vector<16x128xf32> to vector<16x128xbf16>
    %cst_16 = arith.constant dense<0.000000e+00> : vector<16x128xf32>
    %41 = tpu.matmul %39, %40, %cst_16 {dimension_numbers = #tpu.dot_dimension_numbers<[1], [0], [0], [1], [0, 0, 1, 1], [], []>} : vector<16x16xbf16>, vector<16x128xbf16>, vector<16x128xf32> -> vector<16x128xf32>
    %42 = vector.broadcast %9 : vector<1x128xf32> to vector<16x128xf32>
    %43 = arith.addf %41, %42 : vector<16x128xf32>
    %cst_17 = arith.constant 0.000000e+00 : f32
    %44 = vector.broadcast %cst_17 : f32 to vector<16x128xf32>
    %45 = arith.maximumf %43, %44 : vector<16x128xf32>
    %c0_18 = arith.constant 0 : index
    %c0_19 = arith.constant 0 : index
    %46 = vector.load %arg12[%c0_18, %c0_19] : memref<16x128xf32, #tpu.memory_space<vmem>>, vector<16x128xf32>
    tpu.vector_store %arg12[%c0_18, %c0_19], %45 {strides = array<i32>} : memref<16x128xf32, #tpu.memory_space<vmem>>, vector<16x128xf32>,
    %c2_i32 = arith.constant 2 : i32
    %47 = arith.cmpi eq, %arg0, %c2_i32 : i32
    %48 = arith.extui %47 : i1 to i32
    %c0_i32_20 = arith.constant 0 : i32
    %49 = arith.cmpi ne, %48, %c0_i32_20 : i32
    scf.if %49 {
      %c0_21 = arith.constant 0 : index
      %c0_22 = arith.constant 0 : index
      %50 = vector.load %arg8[%c0_21, %c0_22] : memref<6x128xf32, #tpu.memory_space<vmem>>, vector<6x128xf32>
      %c0_23 = arith.constant 0 : index
      %c0_24 = arith.constant 0 : index
      %51 = vector.load %arg7[%c0_23, %c0_24] : memref<2x16xbf16, #tpu.memory_space<vmem>>, vector<2x16xbf16>
      %c0_25 = arith.constant 0 : index
      %c0_26 = arith.constant 0 : index
      %52 = vector.load %arg12[%c0_25, %c0_26] : memref<16x128xf32, #tpu.memory_space<vmem>>, vector<16x128xf32>
      %53 = arith.truncf %52 : vector<16x128xf32> to vector<16x128xbf16>
      %cst_27 = arith.constant dense<0.000000e+00> : vector<2x128xf32>
      %54 = tpu.matmul %51, %53, %cst_27 {dimension_numbers = #tpu.dot_dimension_numbers<[1], [0], [0], [1], [0, 0, 1, 1], [], []>} : vector<2x16xbf16>, vector<16x128xbf16>, vector<2x128xf32> -> vector<2x128xf32>
      %55 = vector.extract_strided_slice %50 {offsets = [0, 0], sizes = [1, 128], strides = [1, 1]} : vector<6x128xf32> to vector<1x128xf32>
      %56 = vector.extract_strided_slice %50 {offsets = [1, 0], sizes = [1, 128], strides = [1, 1]} : vector<6x128xf32> to vector<1x128xf32>
      %cst_28 = arith.constant dense<0.000000e+00> : vector<128xf32>
      %57 = vector.multi_reduction <add>, %54, %cst_28 [0] : vector<2x128xf32> to vector<128xf32>
      %58 = vector.shape_cast %57 : vector<128xf32> to vector<1x128xf32>
      %cst_29 = arith.constant 2.000000e+00 : f32
      %59 = vector.broadcast %cst_29 : f32 to vector<1x128xf32>
      %60 = arith.divf %58, %59 : vector<1x128xf32>
      %61 = arith.mulf %54, %54 : vector<2x128xf32>
      %cst_30 = arith.constant dense<0.000000e+00> : vector<128xf32>
      %62 = vector.multi_reduction <add>, %61, %cst_30 [0] : vector<2x128xf32> to vector<128xf32>
      %63 = vector.shape_cast %62 : vector<128xf32> to vector<1x128xf32>
      %cst_31 = arith.constant 2.000000e+00 : f32
      %64 = vector.broadcast %cst_31 : f32 to vector<1x128xf32>
      %65 = arith.divf %63, %64 : vector<1x128xf32>
      %66 = arith.mulf %60, %60 : vector<1x128xf32>
      %67 = arith.subf %65, %66 : vector<1x128xf32>
      %cst_32 = arith.constant 0.000000e+00 : f32
      %68 = vector.broadcast %cst_32 : f32 to vector<1x128xf32>
      %69 = arith.maximumf %67, %68 : vector<1x128xf32>
      %70 = vector.broadcast %60 : vector<1x128xf32> to vector<2x128xf32>
      %71 = arith.subf %54, %70 : vector<2x128xf32>
      %cst_33 = arith.constant 9.99999974E-6 : f32
      %72 = vector.broadcast %cst_33 : f32 to vector<1x128xf32>
      %73 = arith.addf %69, %72 : vector<1x128xf32>
      %74 = math.rsqrt %73 : vector<1x128xf32>
      %75 = vector.broadcast %74 : vector<1x128xf32> to vector<2x128xf32>
      %76 = arith.mulf %71, %75 : vector<2x128xf32>
      %77 = vector.broadcast %55 : vector<1x128xf32> to vector<2x128xf32>
      %78 = arith.mulf %76, %77 : vector<2x128xf32>
      %79 = vector.broadcast %56 : vector<1x128xf32> to vector<2x128xf32>
      %80 = arith.addf %78, %79 : vector<2x128xf32>
      %81 = arith.truncf %80 : vector<2x128xf32> to vector<2x128xbf16>
      %c0_34 = arith.constant 0 : index
      %c0_35 = arith.constant 0 : index
      %c0_36 = arith.constant 0 : index
      %82 = vector.load %arg9[%c0_34, %c0_35, %c0_36] : memref<1x128x128xbf16, #tpu.memory_space<vmem>>, vector<1x128x128xbf16>
      %83 = vector.shape_cast %82 : vector<1x128x128xbf16> to vector<128x128xbf16>
      %cst_37 = arith.constant dense<0.000000e+00> : vector<2x128xf32>
      %84 = tpu.matmul %81, %83, %cst_37 {dimension_numbers = #tpu.dot_dimension_numbers<[1], [0], [0], [1], [0, 0, 1, 1], [], []>} : vector<2x128xbf16>, vector<128x128xbf16>, vector<2x128xf32> -> vector<2x128xf32>
      %85 = vector.extract_strided_slice %50 {offsets = [2, 0], sizes = [1, 128], strides = [1, 1]} : vector<6x128xf32> to vector<1x128xf32>
      %86 = vector.broadcast %85 : vector<1x128xf32> to vector<2x128xf32>
      %87 = arith.addf %84, %86 : vector<2x128xf32>
      %cst_38 = arith.constant 0.000000e+00 : f32
      %88 = vector.broadcast %cst_38 : f32 to vector<2x128xf32>
      %89 = arith.maximumf %87, %88 : vector<2x128xf32>
      %90 = vector.extract_strided_slice %50 {offsets = [3, 0], sizes = [1, 128], strides = [1, 1]} : vector<6x128xf32> to vector<1x128xf32>
      %91 = vector.extract_strided_slice %50 {offsets = [4, 0], sizes = [1, 128], strides = [1, 1]} : vector<6x128xf32> to vector<1x128xf32>
      %cst_39 = arith.constant dense<0.000000e+00> : vector<128xf32>
      %92 = vector.multi_reduction <add>, %89, %cst_39 [0] : vector<2x128xf32> to vector<128xf32>
      %93 = vector.shape_cast %92 : vector<128xf32> to vector<1x128xf32>
      %cst_40 = arith.constant 2.000000e+00 : f32
      %94 = vector.broadcast %cst_40 : f32 to vector<1x128xf32>
      %95 = arith.divf %93, %94 : vector<1x128xf32>
      %96 = arith.mulf %89, %89 : vector<2x128xf32>
      %cst_41 = arith.constant dense<0.000000e+00> : vector<128xf32>
      %97 = vector.multi_reduction <add>, %96, %cst_41 [0] : vector<2x128xf32> to vector<128xf32>
      %98 = vector.shape_cast %97 : vector<128xf32> to vector<1x128xf32>
      %cst_42 = arith.constant 2.000000e+00 : f32
      %99 = vector.broadcast %cst_42 : f32 to vector<1x128xf32>
      %100 = arith.divf %98, %99 : vector<1x128xf32>
      %101 = arith.mulf %95, %95 : vector<1x128xf32>
      %102 = arith.subf %100, %101 : vector<1x128xf32>
      %cst_43 = arith.constant 0.000000e+00 : f32
      %103 = vector.broadcast %cst_43 : f32 to vector<1x128xf32>
      %104 = arith.maximumf %102, %103 : vector<1x128xf32>
      %105 = vector.broadcast %95 : vector<1x128xf32> to vector<2x128xf32>
      %106 = arith.subf %89, %105 : vector<2x128xf32>
      %cst_44 = arith.constant 9.99999974E-6 : f32
      %107 = vector.broadcast %cst_44 : f32 to vector<1x128xf32>
      %108 = arith.addf %104, %107 : vector<1x128xf32>
      %109 = math.rsqrt %108 : vector<1x128xf32>
      %110 = vector.broadcast %109 : vector<1x128xf32> to vector<2x128xf32>
      %111 = arith.mulf %106, %110 : vector<2x128xf32>
      %112 = vector.broadcast %90 : vector<1x128xf32> to vector<2x128xf32>
      %113 = arith.mulf %111, %112 : vector<2x128xf32>
      %114 = vector.broadcast %91 : vector<1x128xf32> to vector<2x128xf32>
      %115 = arith.addf %113, %114 : vector<2x128xf32>
      %116 = arith.truncf %115 : vector<2x128xf32> to vector<2x128xbf16>
      %c0_45 = arith.constant 0 : index
      %c0_46 = arith.constant 0 : index
      %117 = vector.load %arg10[%c0_45, %c0_46] : memref<128x4xbf16, #tpu.memory_space<vmem>>, vector<128x4xbf16>
      %cst_47 = arith.constant dense<0.000000e+00> : vector<2x4xf32>
      %118 = tpu.matmul %116, %117, %cst_47 {dimension_numbers = #tpu.dot_dimension_numbers<[1], [0], [0], [1], [0, 0, 1, 1], [], []>} : vector<2x128xbf16>, vector<128x4xbf16>, vector<2x4xf32> -> vector<2x4xf32>
      %119 = vector.extract_strided_slice %50 {offsets = [5, 0], sizes = [1, 4], strides = [1, 1]} : vector<6x128xf32> to vector<1x4xf32>
      %120 = vector.broadcast %119 : vector<1x4xf32> to vector<2x4xf32>
      %121 = arith.addf %118, %120 : vector<2x4xf32>
      %cst_48 = arith.constant dense<0xFF800000> : vector<2xf32>
      %122 = vector.multi_reduction <maximumf>, %121, %cst_48 [1] : vector<2x4xf32> to vector<2xf32>
      %123 = vector.shape_cast %122 : vector<2xf32> to vector<2x1xf32>
      %124 = vector.broadcast %123 : vector<2x1xf32> to vector<2x4xf32>
      %125 = arith.subf %121, %124 : vector<2x4xf32>
      %126 = math.exp %125 : vector<2x4xf32>
      %cst_49 = arith.constant dense<0.000000e+00> : vector<2xf32>
      %127 = vector.multi_reduction <add>, %126, %cst_49 [1] : vector<2x4xf32> to vector<2xf32>
      %128 = vector.shape_cast %127 : vector<2xf32> to vector<2x1xf32>
      %129 = math.log %128 : vector<2x1xf32>
      %130 = vector.broadcast %129 : vector<2x1xf32> to vector<2x4xf32>
      %131 = arith.subf %125, %130 : vector<2x4xf32>
      %c0_50 = arith.constant 0 : index
      %c0_51 = arith.constant 0 : index
      %132 = vector.load %arg11[%c0_50, %c0_51] : memref<2x4xf32, #tpu.memory_space<vmem>>, vector<2x4xf32>
      tpu.vector_store %arg11[%c0_50, %c0_51], %131 {strides = array<i32>} : memref<2x4xf32, #tpu.memory_space<vmem>>, vector<2x4xf32>,
    } else {
    }
    return
  }
  func.func @transform_1(%arg0: i32) -> (i32, i32) {
    %c0_i32 = arith.constant 0 : i32
    %c0_i32_0 = arith.constant 0 : i32
    %c0_i32_1 = arith.constant 0 : i32
    return %c0_i32, %c0_i32_0 : i32, i32
  }
  func.func @transform_2(%arg0: i32) -> (i32, i32) {
    %c0_i32 = arith.constant 0 : i32
    %c0_i32_0 = arith.constant 0 : i32
    %c0_i32_1 = arith.constant 0 : i32
    return %c0_i32, %c0_i32_0 : i32, i32
  }
  func.func @transform_3(%arg0: i32) -> (i32, i32) {
    %c0_i32 = arith.constant 0 : i32
    %c0_i32_0 = arith.constant 0 : i32
    %c0_i32_1 = arith.constant 0 : i32
    return %c0_i32, %c0_i32_0 : i32, i32
  }
  func.func @transform_4(%arg0: i32) -> (i32, i32, i32) {
    %c0_i32 = arith.constant 0 : i32
    %c0_i32_0 = arith.constant 0 : i32
    %c0_i32_1 = arith.constant 0 : i32
    return %arg0, %c0_i32, %c0_i32_0 : i32, i32, i32
  }
  func.func @transform_5(%arg0: i32) -> (i32, i32, i32) {
    %c0_i32 = arith.constant 0 : i32
    %c0_i32_0 = arith.constant 0 : i32
    %c0_i32_1 = arith.constant 0 : i32
    return %arg0, %c0_i32, %c0_i32_0 : i32, i32, i32
  }
  func.func @transform_6(%arg0: i32) -> (i32, i32) {
    %c0_i32 = arith.constant 0 : i32
    %c0_i32_0 = arith.constant 0 : i32
    %c0_i32_1 = arith.constant 0 : i32
    return %c0_i32, %c0_i32_0 : i32, i32
  }
  func.func @transform_7(%arg0: i32) -> (i32, i32) {
    %c0_i32 = arith.constant 0 : i32
    %c0_i32_0 = arith.constant 0 : i32
    %c0_i32_1 = arith.constant 0 : i32
    return %c0_i32, %c0_i32_0 : i32, i32
  }
  func.func @transform_8(%arg0: i32) -> (i32, i32, i32) {
    %c0_i32 = arith.constant 0 : i32
    %c0_i32_0 = arith.constant 0 : i32
    %c0_i32_1 = arith.constant 0 : i32
    %c0_i32_2 = arith.constant 0 : i32
    return %c0_i32, %c0_i32_0, %c0_i32_1 : i32, i32, i32
  }
  func.func @transform_9(%arg0: i32) -> (i32, i32) {
    %c0_i32 = arith.constant 0 : i32
    %c0_i32_0 = arith.constant 0 : i32
    %c0_i32_1 = arith.constant 0 : i32
    return %c0_i32, %c0_i32_0 : i32, i32
  }
  func.func @transform_10(%arg0: i32) -> (i32, i32) {
    %c0_i32 = arith.constant 0 : i32
    %c0_i32_0 = arith.constant 0 : i32
    %c0_i32_1 = arith.constant 0 : i32
    return %c0_i32, %c0_i32_0 : i32, i32
  }
}

</mosaic_0001>

<bundles_post_ra>
// kernel: tpu_custom_call.1
= control target key start
LH: loop header
LB: loop body
LE: loop exit
PB: predicated region body
PF: predicated region fallthrough
CT: control target
= control target key end

     0   :  { %s2216_s0 = inlined_call_operand.hbm [shape: f32[16,128], index: 0, kind: input, shape index: {}]   ;;  %s2217_s1 = inlined_call_operand.hbm [shape: bf16[16,16], index: 1, kind: input, shape index: {}]   ;;  %s2218_s2 = inlined_call_operand.hbm [shape: f32[2,128], index: 2, kind: input, shape index: {}]   ;;  %s2219_s3 = inlined_call_operand.vmem [shape: bf16[128,128], index: 3, kind: input, shape index: {}]   ;;  %s2220_s4 = inlined_call_operand.vmem [shape: f32[3,3,128], index: 4, kind: input, shape index: {}]   ;;  %s2221_s5 = inlined_call_operand.hbm [shape: bf16[3,128,128], index: 5, kind: input, shape index: {}]   ;;  %s2222_s6 = inlined_call_operand.vmem [shape: bf16[2,16], index: 6, kind: input, shape index: {}]   ;;  %s2223_s7 = inlined_call_operand.vmem [shape: f32[6,128], index: 7, kind: input, shape index: {}]   ;;  %s2224_s8 = inlined_call_operand.hbm [shape: bf16[1,128,128], index: 8, kind: input, shape index: {}]   ;;  %s2225_s9 = inlined_call_operand.vmem [shape: bf16[128,4], index: 9, kind: input, shape index: {}]   ;;  %s2226_s10 = inlined_call_operand.hbm [shape: f32[2,4], index: 10, kind: output, shape index: {}]  }
   0x1   :  { %2236 = sst [smem:[#allocation24_spill]] %s2219_s3 }
   0x2   :  { %2237 = sst [smem:[#allocation25_spill]] %s2222_s6 }
   0x3   :  { %2238 = sst [smem:[#allocation26_spill]] %s2223_s7 }
   0x4   :  { %2239 = sst [smem:[#allocation27_spill]] %s2225_s9 }
   0x5   :  { %2240 = sst [smem:[#allocation28_spill]] %s2226_s10 }
   0x6   :  { %15 = vsyncpa [#allocation5], 0 }
   0x7   :  { %16 = vsyncpa [#allocation8], 0 }
   0x8   :  { %17 = vsyncpa [#allocation6], 0  ;;  %s1842_s13 = smov 0   ;;  %s1844_s14 = smov 0  }
   0x9   :  { %s1846_s15 = smov 0   ;;  %s1848_s16 = smov 0  }
   0xa LB: > { %s1861_s17 = sadd.s32 4294967295, %s1771_s16   ;;  %s1864_s18 = sadd.s32 1, %s1771_s16   ;;  %s1771_s16 = sphi %s1848_s16, %s2264_s16   ;;  %s1767_s15 = sphi %s1846_s15, %s2268_s15   ;;  %s1763_s14 = sphi %s1844_s14, %s2267_s14   ;;  %s1759_s13 = sphi %s1842_s13, %s2266_s13  }
   0xb   : > { %2241 = sst [smem:[#allocation22_spill]] %s1864_s18  ;;  %s116_s19 = ssub.s32 %s1771_s16, %s1864_s18 }
   0xc   : > { %s119_s20 = sadd.s32 1, %s1767_s15  ;;  %p117_p0 = scmp.eq.s32.totalorder %s116_s19, 0 }
   0xd   : > { %p126_p1 = scmp.ne.s32.totalorder %s1767_s15, %s1763_s14  ;;  %p127_p2 = scmp.eq.s32.totalorder %s1771_s16, 0 }
   0xe   : > { %p132_p3 = scmp.ne.s32.totalorder %s1763_s14, %s1759_s13  ;;  %p2227_p5 = scmp.eq.s32.totalorder %s1861_s17, 0 }
   0xf   : > { %s1874_s21 = scalar_select %p117_p0, %s1767_s15, %s119_s20  }
  0x10   : > { %p1876_p4 = por %p127_p2, %p126_p1  ;;  %p1237_p6 = scmp.ge.s32.totalorder %s1771_s16, 1 }
  0x11   : > { %2242 = sst [smem:[#allocation23_spill]] %s1874_s21  ;;  %p248_p7 = scmp.lt.s32.totalorder %s1771_s16, 4 }
  0x12   : > { %p1885_p8 = por %p2227_p5, %p132_p3  ;;  %s1773_s25 = smov [#allocation4]  }
  0x13   : > { %p1890_p10 = pnand %p1237_p6, %p248_p7  ;;  %s260_s26 = sshll.u32 %s1773_s25, 4  ;;  %s261_s26 = int_to_ptr.vmem [resolvable:$true] %s260_s26 }
  0x14   : > { %s2244_s23 = scalar_select %p1885_p8, 1, 0 }
  0x15   : > { %s2245_s24 = scalar_select %p1890_p10, 1, 0 }
  0x16   : > { %p1444_p11 = pneg %p1890_p10  ;;  %p1461_p13 = scmp.lt.s32.totalorder %s1771_s16, 3 }
  0x17   : > { %s1557_s11 = scalar_lea.hbm %s2217_s1, 128 }
  0x18   : > { %p1898_p12 = pnand %p1444_p11, %p2227_p5  ;;  %p1905_p0 = pnand %p1461_p13, %p1876_p4 }
  0x19   : > { %p1558_p1 = scmp.ne.s32.totalorder %s2217_s1, %s1557_s11  ;;  %p1564_p6 = scmp.lt.u32.totalorder %s1557_s11, %s2217_s1 }
  0x1a   : > { %s2247_s28 = scalar_select %p1905_p0, 1, 0 }
  0x1b   : > { %p1917_p2 = pneg %p1898_p12 }
  0x1d   : > { %p1560_p3 = pnand %p1917_p2, %p1558_p1 }
  0x1f   : > { %p1561_p4 = pneg %p1560_p3 }
  0x21   : > { %p1566_p7 = pnand %p1564_p6, %p1561_p4 }
  0x23   : > { %1569 = shalt.err (!%p1566_p7)
}
  0x24   : > { %s1570_s25 = scalar_lea.vmem %s261_s26, 128  ;;  %p1578_p5 = scmp.lt.s32.totalorder %s261_s26, %s261_s26 }
  0x25   : > { %p1571_p11 = scmp.ne.s32.totalorder %s261_s26, %s1570_s25  ;;  %p1579_p8 = scmp.lt.s32.totalorder %s1570_s25, %s1570_s25 }
  0x27   : > { %p1573_p13 = pnand %p1571_p11, %p1917_p2  ;;  %p1580_p10 = por %p1579_p8, %p1578_p5 }
  0x29   : > { %p1574_p9 = pneg %p1573_p13 }
  0x2b   : > { %p1581_p0 = pnand %p1580_p10, %p1574_p9 }
  0x2d   : > { %1584 = shalt.err (!%p1581_p0)
}
  0x2e   : > { %s1774_s29 = smov 64   ;;  %s1775_s30 = smov 4  }
  0x2f   : > { %1447 = dma.hbm_to_vmem [thread:$0]  (!%p1898_p12), %s2217_s1, 128, %s261_s26, [#allocation5], %s1774_s29, %s1774_s29, %s1775_s30  }
  0x30   : > { %s1776_s13 = smov [#allocation7]   ;;  %s1777_s22 = smov [#allocation10]  }
  0x31   : > { %s274_s20 = sshll.u32 %s1776_s13, 4  ;;  %s293_s25 = sshll.u32 %s1777_s22, 4  ;;  %s275_s20 = int_to_ptr.vmem [resolvable:$true] %s274_s20  ;;  %s294_s25 = int_to_ptr.vmem [resolvable:$true] %s293_s25 }
  0x32   : > { %s1585_s10 = scalar_lea.hbm %s2218_s2, 32 }
  0x33   : > { %p1586_p5 = scmp.ne.s32.totalorder %s2218_s2, %s1585_s10  ;;  %p1592_p10 = scmp.lt.u32.totalorder %s1585_s10, %s2218_s2 }
  0x35   : > { %p1588_p8 = pnand %p1586_p5, %p1917_p2 }
  0x37   : > { %p1589_p9 = pneg %p1588_p8 }
  0x39   : > { %p1594_p0 = pnand %p1592_p10, %p1589_p9 }
  0x3b   : > { %1597 = shalt.err (!%p1594_p0)
}
  0x3c   : > { %s1598_s26 = scalar_lea.vmem %s275_s20, 32  ;;  %p1606_p6 = scmp.lt.s32.totalorder %s275_s20, %s275_s20 }
  0x3d   : > { %p1599_p1 = scmp.ne.s32.totalorder %s275_s20, %s1598_s26  ;;  %p1607_p7 = scmp.lt.s32.totalorder %s1598_s26, %s1598_s26 }
  0x3f   : > { %p1601_p3 = pnand %p1599_p1, %p1917_p2  ;;  %p1608_p11 = por %p1607_p7, %p1606_p6 }
  0x41   : > { %p1602_p4 = pneg %p1601_p3 }
  0x43   : > { %p1609_p13 = pnand %p1608_p11, %p1602_p4 }
  0x45   : > { %1612 = shalt.err (!%p1609_p13)
}
  0x46   : > { %1450 = dma.hbm_to_vmem [thread:$0]  (!%p1898_p12), %s2218_s2, 32, %s275_s20, [#allocation8]  }
  0x47   : > { %s317_s3 = sand.u32 1, %s1771_s16   ;;  %s1613_s18 = scalar_lea.hbm %s2224_s8, 1024 }
  0x48   : > { %p1614_p5 = scmp.ne.s32.totalorder %s2224_s8, %s1613_s18  ;;  %p1620_p10 = scmp.lt.u32.totalorder %s1613_s18, %s2224_s8 }
  0x4a   : > { %p1616_p8 = pnand %p1614_p5, %p1917_p2 }
  0x4c   : > { %p1617_p9 = pneg %p1616_p8 }
  0x4e   : > { %p1622_p0 = pnand %p1620_p10, %p1617_p9 }
  0x50   : > { %1625 = shalt.err (!%p1622_p0)
}
  0x51   : > { %s1626_s20 = scalar_lea.vmem %s294_s25, 1024  ;;  %p1634_p6 = scmp.lt.s32.totalorder %s294_s25, %s294_s25 }
  0x52   : > { %p1627_p1 = scmp.ne.s32.totalorder %s294_s25, %s1626_s20  ;;  %p1635_p7 = scmp.lt.s32.totalorder %s1626_s20, %s1626_s20 }
  0x54   : > { %p1629_p3 = pnand %p1627_p1, %p1917_p2  ;;  %p1636_p11 = por %p1635_p7, %p1634_p6 }
  0x56   : > { %p1630_p4 = pneg %p1629_p3 }
  0x58   : > { %p1637_p13 = pnand %p1636_p11, %p1630_p4 }
  0x5a   : > { %1640 = shalt.err (!%p1637_p13)
}
  0x5b   : > { %1453 = dma.hbm_to_vmem [thread:$0]  (!%p1898_p12), %s2224_s8, 1024, %s294_s25, [#allocation8], %s1774_s29, %s1774_s29, %s1775_s30  }
  0x5c   : > { %s319_s19 = sand.u32 1, %s1767_s15   ;;  %s1293_s9 = sshll.u32 %s1771_s16, 10 }
  0x5d   : > { %s1242_s7 = sshll.u32 %s319_s19, 6  ;;  %s1981_s18 = scalar_lea.hbm %s2221_s5, %s1293_s9 }
  0x5e   : > { %s321_s27 = scalar_lea.vmem [#allocation9], %s1242_s7  ;;  %s1985_s11 = scalar_lea.sflag [#allocation5], %s317_s3 }
  0x5f   : > { %s328_s21 = sshll.u32 %s321_s27, 4  ;;  %s1641_s12 = scalar_lea.hbm %s1981_s18, 1024  ;;  %s1983_s21 = int_to_ptr.vmem [resolvable:$true] %s328_s21 }
  0x60   : > { %p1642_p12 = scmp.ne.s32.totalorder %s1981_s18, %s1641_s12  ;;  %p2249_p2 = scmp.ne.s32.totalorder %s2247_s28, 0 }
  0x61   : > { %s1646_s13 = scalar_lea.hbm %s2221_s5, 3072  ;;  %p1647_p10 = scmp.lt.u32.totalorder %s1981_s18, %s2221_s5 }
  0x62   : > { %p1643_p5 = pneg %p2249_p2  ;;  %p1648_p0 = scmp.lt.u32.totalorder %s1646_s13, %s1641_s12 }
  0x63   : > { %p1650_p3 = scmp.lt.u32.totalorder %s1641_s12, %s1981_s18 }
  0x64   : > { %p1644_p8 = pnand %p1643_p5, %p1642_p12  ;;  %p1649_p1 = por %p1648_p0, %p1647_p10 }
  0x66   : > { %p1645_p9 = pneg %p1644_p8  ;;  %p1651_p4 = por %p1650_p3, %p1649_p1 }
  0x68   : > { %p1652_p6 = pnand %p1651_p4, %p1645_p9 }
  0x6a   : > { %1655 = shalt.err (!%p1652_p6)
}
  0x6b   : > { %s1656_s3 = scalar_lea.vmem %s1983_s21, 1024  ;;  %s1778_s26 = smov [#allocation9]  }
  0x6c   : > { %p1657_p7 = scmp.ne.s32.totalorder %s1983_s21, %s1656_s3  ;;  %s1661_s19 = sshll.u32 %s1778_s26, 4  ;;  %s1662_s19 = int_to_ptr.vmem [resolvable:$false] %s1661_s19 }
  0x6d   : > { %s1663_s7 = scalar_lea.vmem %s1662_s19, 2048  ;;  %p1664_p12 = scmp.lt.s32.totalorder %s1983_s21, %s1662_s19 }
  0x6e   : > { %p1659_p11 = pnand %p1657_p7, %p1643_p5  ;;  %p1665_p8 = scmp.lt.s32.totalorder %s1663_s7, %s1656_s3 }
  0x70   : > { %p1660_p13 = pneg %p1659_p11  ;;  %p1666_p10 = por %p1665_p8, %p1664_p12 }
  0x72   : > { %p1667_p0 = pnand %p1666_p10, %p1660_p13 }
  0x74   : > { %1670 = shalt.err (!%p1667_p0)
}
  0x75   : > { %1457 = dma.hbm_to_vmem [thread:$0]  (!%p2249_p2), %s1981_s18, 1024, %s1983_s21, %s1985_s11, %s1774_s29, %s1774_s29, %s1775_s30  }
  0x76   : > { %p2250_p5 = scmp.ne.s32.totalorder %s2245_s24, 0 }
  0x77   : > { %p2251_p9 = scmp.eq.s32.totalorder (!%p2250_p5), %s1861_s17, 0 }
  0x78   : > { %340 = sbr.rel (%p2250_p5) target bundleno = 1997 (0x7cd), region = 56 }
  0x7f   : > { %1736 = dma.done.wait (%p2251_p9), [#allocation5], 128   ;;  %p2252_p1 = pmov %p2251_p9 }
  0x81   : > { %1738 = vsyncadd (%p2252_p1), [#allocation5], 4294967168  ;;  %p2253_p3 = pmov %p2252_p1 }
  0x82   : > { %p2254_p4 = pmov %p2252_p1 }
  0x83   : > { %1740 = dma.done.wait (%p2253_p3), [#allocation8], 32  }
  0x84   : > { %1742 = vsyncadd (%p2254_p4), [#allocation8], 4294967264  ;;  %s350_s28 = sand.u32 1, %s1861_s17   ;;  %s352_s29 = sand.u32 1, %s1763_s14  }
  0x85   : > { %s1248_s30 = sshll.u32 %s352_s29, 6  ;;  %s351_s24 = scalar_lea.sflag [#allocation5], %s350_s28 }
  0x86   : > { %s2028_s9 = scalar_lea.vmem [#allocation9], %s1248_s30  ;;  %p2255_p2 = scmp.ne.s32.totalorder %s2244_s23, 0 }
  0x88   : > { %1744 = dma.done.wait (%p2255_p2), %s351_s24, 1024  }
  0x89   : > { %1746 = vsyncadd (%p2255_p2), %s351_s24, 4294966272  ;;  %p2256_p6 = pmov %p2252_p1 }
  0x8a   : > { %p2257_p7 = pmov %p2252_p1 }
  0x8b   : > { %1748 = dma.done.wait (%p2256_p6), [#allocation8], 1024  }
  0x8c   : > { %1750 = vsyncadd (%p2257_p7), [#allocation8], 4294966272  ;;  %p392_p11 = scmp.lt.s32.totalorder %s1861_s17, 2  ;;  %p2258_p13 = scmp.ne.s32.totalorder %s1861_s17, 0 }
  0x8d   : > { %s1779_s23 = smov (!%p2258_p13), [#allocation2]   ;;  %s1671_s25 = scalar_lea.hbm (!%p2258_p13), %s2216_s0, 256 }
  0x8e   : > { %s393_s6 = scalar_select %p392_p11, %s1861_s17, 2 }
  0x8f   : > { %400 = sbr.rel (%p2258_p13) target bundleno = 423 (0x1a7), region = 76  ;;  %s408_s11 = sshll.u32 (!%p2258_p13), %s1779_s23, 4  ;;  %s409_s11 = int_to_ptr.vmem [resolvable:$true] %s408_s11 }
  0x90   : > { %s1250_s10 = sshll.u32 %s393_s6, 2  ;;  %p1672_p12 = scmp.ne.s32.totalorder (!%p2258_p13), %s2216_s0, %s1671_s25 }
  0x91   : > { %s2043_s21 = scalar_lea.vmem %s2220_s4, %s1250_s10  ;;  %p1675_p8 = scmp.lt.u32.totalorder (!%p2258_p13), %s1671_s25, %s2216_s0 }
  0x93   : > { %p1677_p10 = pnand (!%p2258_p13), %p1675_p8, %p1672_p12 }
  0x96   : > { %1680 = shalt.err (!%p1677_p10)  }
  0x97   : > { %s1681_s26 = scalar_lea.vmem %s409_s11, 256  ;;  %p1686_p5 = scmp.lt.s32.totalorder %s409_s11, %s409_s11 }
  0x98   : > { %p1682_p0 = scmp.ne.s32.totalorder %s409_s11, %s1681_s26  ;;  %p1687_p9 = scmp.lt.s32.totalorder %s1681_s26, %s1681_s26 }
  0x9a   : > { %p1688_p1 = por %p1687_p9, %p1686_p5 }
  0x9c   : > { %p1689_p3 = pnand %p1688_p1, %p1682_p0 }
  0x9e   : > { %1692 = shalt.err (!%p1689_p3)  }
  0x9f   : > { %411 = dma.hbm_to_vmem [thread:$0]  %s2216_s0, 256, %s409_s11, [#allocation3] }
  0xa0   : > { %1751 = dma.done.wait [#allocation3], 256 }
  0xa1   : > { %1752 = vsyncadd [#allocation3], 4294967040  ;;  %v1780_v0 = vmov 0.0   ;;  %vm1781_vm0 = vmmov 0   ;;  %s2259_s30 = sld [smem:[#allocation24_spill]]  ;;  %v416_v4 = vld [vmem:[#allocation2] sm:$0xff]  ;;  %v446_v32 = vlaneseq }
  0xa2   : > { %1334 = vmatprep.subr.bf16.mxu0 %v1780_v0  ;;  %1350 = vmatprep.mubr.msk.bf16.mxu0 %vm1781_vm0, %v1780_v0  ;;  %v417_v5 = vld [vmem:[#allocation2 + $0x8] sm:$0xff]  ;;  %v427_v7 = vmul.f32 %v416_v4, %v416_v4  ;;  %v415_v36 = vld [vmem:[#allocation7] sm:$0x3] }
  0xa3   : > { %v418_v6 = vadd.f32 %v417_v5, %v416_v4  ;;  %v428_v8 = vmul.f32 %v417_v5, %v417_v5  ;;  %v447_v34 = vshrl.u32 %v446_v32, 7 }
  0xa5   : > { %v419_v10 = vrot.slane %v418_v6, 4  ;;  %v429_v11 = vadd.f32 %v428_v8, %v427_v7  ;;  %v448_v35 = vsub.s32 0, %v447_v34  ;;  %v454_v39 = vsub.s32 1, %v447_v34 }
  0xa7   : > { %v1512_v1 = vld [vmem:[%s2259_s30] sm:$0xff]   ;;  %v1513_v2 = vld [vmem:[%s2259_s30 + $0x8] sm:$0xff]   ;;  %v1514_v3 = vld [vmem:[%s2259_s30 + $0x10] sm:$0xff]   ;;  %v420_v12 = vadd.f32 %v419_v10, %v418_v6  ;;  %v430_v13 = vrot.slane %v429_v11, 4  ;;  %v449_v40 = vrot.slane %v415_v36, %v448_v35  ;;  %v455_v44 = vrot.slane %v415_v36, %v454_v39 }
  0xa8   : > { %1335 = vmatpush3.bf16.msra.mxu0 %v1512_v1  ;;  %v1515_v9 = vld [vmem:[%s2259_s30 + $0x18] sm:$0xff]   ;;  %v1516_v14 = vld [vmem:[%s2259_s30 + $0x20] sm:$0xff]   ;;  %v1517_v19 = vld [vmem:[%s2259_s30 + $0x28] sm:$0xff]  }
  0xa9   : > { %1336 = vmatprep.subr.bf16.mxu0 %v1780_v0  ;;  %v421_v15 = vrot.slane %v420_v12, 2  ;;  %v431_v16 = vadd.f32 %v430_v13, %v429_v11  ;;  %v1518_v24 = vld [vmem:[%s2259_s30 + $0x30] sm:$0xff]   ;;  %v1519_v29 = vld [vmem:[%s2259_s30 + $0x38] sm:$0xff]  }
  0xab   : > { %v422_v17 = vadd.f32 %v421_v15, %v420_v12  ;;  %v432_v18 = vrot.slane %v431_v16, 2 }
  0xac   : > { %1337 = vmatpush3.bf16.msra.mxu0 %v1513_v2 }
  0xad   : > { %1338 = vmatprep.subr.bf16.mxu0 %v1780_v0  ;;  %v423_v20 = vrot.slane %v422_v17, 1  ;;  %v433_v21 = vadd.f32 %v432_v18, %v431_v16 }
  0xaf   : > { %v424_v22 = vadd.f32 %v423_v20, %v422_v17  ;;  %v434_v23 = vrot.slane %v433_v21, 1 }
  0xb0   : > { %1339 = vmatpush3.bf16.msra.mxu0 %v1514_v3 }
  0xb1   : > { %1340 = vmatprep.subr.bf16.mxu0 %v1780_v0  ;;  %v426_v25 = vmul.f32 0.0625, %v424_v22  ;;  %v435_v26 = vadd.f32 %v434_v23, %v433_v21 }
  0xb3   : > { %v436_v27 = vmul.f32 0.0625, %v435_v26  ;;  %v437_v28 = vmul.f32 %v426_v25, %v426_v25  ;;  %v440_v37 = vsub.f32 %v416_v4, %v426_v25  ;;  %v441_v38 = vsub.f32 %v417_v5, %v426_v25 }
  0xb4   : > { %1341 = vmatpush3.bf16.msra.mxu0 %v1515_v9 }
  0xb5   : > { %1342 = vmatprep.subr.bf16.mxu0 %v1780_v0  ;;  %v438_v30 = vsub.f32 %v436_v27, %v437_v28 }
  0xb7   : > { %v439_v31 = vmax.f32 %v438_v30, 0.0 }
  0xb8   : > { %1343 = vmatpush3.bf16.msra.mxu0 %v1516_v14 }
  0xb9   : > { %1344 = vmatprep.subr.bf16.mxu0 %v1780_v0  ;;  %v442_v33 = vadd.f32 1e-05, %v439_v31 }
  0xbb   : > { %1520 = vrsqrt.f32 %v442_v33 }
  0xbc   : > { %1345 = vmatpush3.bf16.msra.mxu0 %v1517_v19 }
  0xbd   : > { %1346 = vmatprep.subr.bf16.mxu0 %v1780_v0 }
  0xc0   : > { %1347 = vmatpush3.bf16.msra.mxu0 %v1518_v24 }
  0xc1   : > { %1348 = vmatprep.subr.bf16.mxu0 %v1780_v0 }
  0xc4   : > { %1349 = vmatpush3.bf16.msra.mxu0 %v1519_v29 }
  0xc5   : > { %v1521_v41 = vpop.eup %1520 }
  0xc6   : > { %v444_v42 = vmul.f32 %v1521_v41, %v440_v37  ;;  %v445_v43 = vmul.f32 %v1521_v41, %v441_v38 }
  0xc8   : > { %v450_v45 = vmul.f32 %v449_v40, %v444_v42  ;;  %v451_v46 = vmul.f32 %v449_v40, %v445_v43 }
  0xca   : > { %v456_v47 = vadd.f32 %v455_v44, %v450_v45  ;;  %v457_v48 = vadd.f32 %v455_v44, %v451_v46 }
  0xcc   : > { %v458_v49 = vpack.c.bf16 %v457_v48, %v456_v47 }
  0xce   : > { %1351 = vmatmul.mubr.bf16.vlgmr.msra.gmra.mrb[0].mxu0 %v458_v49 }
 0x1a1   : > { %v557_v50 = vpop.f32.mrb[0].mxu0 }
 0x1a2   : > { %v564_v51 = vmax.f32 %v557_v50, 0.0  ;;  %v1352_v52 = vpop.f32.mrb[1].mxu0 }
 0x1a3   : > { %v560_v53 = vpop.f32.mrb[2].mxu0 }
 0x1a4   : > { %566 = vst [vmem:[#allocation2] sm:$0xff] %v564_v51  ;;  %v565_v54 = vmax.f32 %v560_v53, 0.0  ;;  %v1353_v55 = vpop.f32.mrb[3].mxu0 }
 0x1a6   : > { %567 = vst [vmem:[#allocation2 + $0x8] sm:$0xff] %v565_v54 }
 0x1a7 PF: > { %v1522_v56 = vld [vmem:[%s2028_s9] sm:$0xff]   ;;  %v1782_v57 = vmov 0.0   ;;  %v1523_v58 = vld [vmem:[%s2028_s9 + $0x8] sm:$0xff]   ;;  %vm1783_vm1 = vmmov 0   ;;  %v1524_v59 = vld [vmem:[%s2028_s9 + $0x10] sm:$0xff]   ;;  %v599_v24 = vlaneseq  ;;  %vm729_vm2 = vcmask 130048  }
 0x1a8   : > { %1354 = vmatprep.subr.bf16.mxu0 %v1782_v57  ;;  %1374 = vmatprep.subr.bf16.mxu1 %v1782_v57  ;;  %v1525_v1 = vld [vmem:[%s2028_s9 + $0x18] sm:$0xff]   ;;  %v1526_v6 = vld [vmem:[%s2028_s9 + $0x20] sm:$0xff]   ;;  %v1527_v11 = vld [vmem:[%s2028_s9 + $0x28] sm:$0xff]   ;;  %p1270_p4 = scmp.ne.s32.totalorder %s1861_s17, 2 }
 0x1a9   : > { %1355 = vmatpush3.bf16.msra.mxu0 %v1522_v56  ;;  %1370 = vmatprep.mubr.msk.bf16.mxu0 %vm1783_vm1, %v1782_v57  ;;  %v1528_v16 = vld [vmem:[%s2028_s9 + $0x30] sm:$0xff]   ;;  %v1529_v21 = vld [vmem:[%s2028_s9 + $0x38] sm:$0xff]   ;;  %v2091_v26 = vshrl.u32 %v599_v24, 7  ;;  %v568_v28 = vld [vmem:[%s2043_s21] sm:$0x7]  ;;  %vm1785_vm3 = vmmov (!%p1270_p4), 0  }
 0x1aa   : > { %1356 = vmatprep.subr.bf16.mxu0 %v1782_v57  ;;  %1376 = vmatprep.mubr.msk.bf16.mxu1 %vm1783_vm1, %v1782_v57  ;;  %v1530_v47 = vld [vmem:[#allocation4] sm:$0xff]   ;;  %s2260_s26 = sld [smem:[#allocation25_spill]] (!%p1270_p4)  ;;  %vm830_vm4 = vcmask (!%p1270_p4), 1041408   ;;  %s2261_s28 = sld [smem:[#allocation26_spill]] (!%p1270_p4)  ;;  %vm1119_vm5 = vcmask (!%p1270_p4), 25600  }
 0x1ab   : > { %v569_v60 = vld [vmem:[#allocation2] sm:$0xff]  ;;  %v601_v27 = vsub.s32 0, %v2091_v26  ;;  %v607_v31 = vsub.s32 1, %v2091_v26  ;;  %v722_v48 = vsub.s32 2, %v2091_v26  ;;  %s2262_s6 = sld [smem:[#allocation27_spill]] (!%p1270_p4) }
 0x1ac   : > { %v580_v63 = vmul.f32 %v569_v60, %v569_v60 }
 0x1ad   : > { %1357 = vmatpush3.bf16.msra.mxu0 %v1523_v58  ;;  %v570_v61 = vld [vmem:[#allocation2 + $0x8] sm:$0xff]  ;;  %v602_v32 = vrot.slane %v568_v28, %v601_v27  ;;  %v608_v36 = vrot.slane %v568_v28, %v607_v31  ;;  %v723_v49 = vrot.slane %v568_v28, %v722_v48 }
 0x1ae   : > { %1358 = vmatprep.subr.bf16.mxu0 %v1782_v57  ;;  %v571_v62 = vadd.f32 %v570_v61, %v569_v60  ;;  %v581_v0 = vmul.f32 %v570_v61, %v570_v61 }
 0x1b0   : > { %v572_v2 = vrot.slane %v571_v62, 4  ;;  %v582_v3 = vadd.f32 %v581_v0, %v580_v63  ;;  %v1533_v63 = vld [vmem:[#allocation10] sm:$0xff] (!%p1270_p4)   ;;  %v1534_v0 = vld [vmem:[#allocation10 + $0x8] sm:$0xff] (!%p1270_p4)  }
 0x1b1   : > { %1359 = vmatpush3.bf16.msra.mxu0 %v1524_v59 }
 0x1b2   : > { %1360 = vmatprep.subr.bf16.mxu0 %v1782_v57  ;;  %v573_v4 = vadd.f32 %v572_v2, %v571_v62  ;;  %v583_v5 = vrot.slane %v582_v3, 4  ;;  %v783_v62 = vld [vmem:[%s2260_s26] sm:$0x1] (!%p1270_p4)  ;;  %v1536_v2 = vld [vmem:[#allocation10 + $0x18] sm:$0xff] (!%p1270_p4)  }
 0x1b4   : > { %v574_v7 = vrot.slane %v573_v4, 2  ;;  %v584_v8 = vadd.f32 %v583_v5, %v582_v3  ;;  %v1537_v3 = vld [vmem:[#allocation10 + $0x20] sm:$0xff] (!%p1270_p4)   ;;  %v1539_v5 = vld [vmem:[#allocation10 + $0x30] sm:$0xff] (!%p1270_p4)  }
 0x1b5   : > { %1361 = vmatpush3.bf16.msra.mxu0 %v1525_v1  ;;  %v1535_v1 = vld [vmem:[#allocation10 + $0x10] sm:$0xff] (!%p1270_p4)  }
 0x1b6   : > { %1362 = vmatprep.subr.bf16.mxu0 %v1782_v57  ;;  %v575_v9 = vadd.f32 %v574_v7, %v573_v4  ;;  %v585_v10 = vrot.slane %v584_v8, 2  ;;  %v1538_v4 = vld [vmem:[#allocation10 + $0x28] sm:$0xff] (!%p1270_p4)  }
 0x1b8   : > { %v576_v12 = vrot.slane %v575_v9, 1  ;;  %v586_v13 = vadd.f32 %v585_v10, %v584_v8 }
 0x1b9   : > { %1363 = vmatpush3.bf16.msra.mxu0 %v1526_v6  ;;  %v1540_v6 = vld [vmem:[#allocation10 + $0x38] sm:$0xff] (!%p1270_p4)  }
 0x1ba   : > { %1364 = vmatprep.subr.bf16.mxu0 %v1782_v57  ;;  %v577_v14 = vadd.f32 %v576_v12, %v575_v9  ;;  %v587_v15 = vrot.slane %v586_v13, 1 }
 0x1bc   : > { %v579_v17 = vmul.f32 0.0625, %v577_v14  ;;  %v588_v18 = vadd.f32 %v587_v15, %v586_v13 }
 0x1bd   : > { %1365 = vmatpush3.bf16.msra.mxu0 %v1527_v11 }
 0x1be   : > { %1366 = vmatprep.subr.bf16.mxu0 %v1782_v57  ;;  %v589_v19 = vmul.f32 0.0625, %v588_v18  ;;  %v590_v20 = vmul.f32 %v579_v17, %v579_v17  ;;  %v593_v29 = vsub.f32 %v569_v60, %v579_v17  ;;  %v594_v30 = vsub.f32 %v570_v61, %v579_v17 }
 0x1bf   : > { %v1784_v60 = vmov (!%p1270_p4), 0.0  }
 0x1c0   : > { %v591_v22 = vsub.f32 %v589_v19, %v590_v20 }
 0x1c1   : > { %1367 = vmatpush3.bf16.msra.mxu0 %v1528_v16 }
 0x1c2   : > { %1368 = vmatprep.subr.bf16.mxu0 %v1782_v57  ;;  %v592_v23 = vmax.f32 %v591_v22, 0.0 }
 0x1c4   : > { %v595_v25 = vadd.f32 1e-05, %v592_v23 }
 0x1c5   : > { %1369 = vmatpush3.bf16.msra.mxu0 %v1529_v21 }
 0x1c6   : > { %1531 = vrsqrt.f32 %v595_v25  ;;  %1380 = vmatprep.subr.bf16.mxu0 (!%p1270_p4), %v1784_v60 }
 0x1d0   : > { %v1532_v33 = vpop.eup %1531 }
 0x1d1   : > { %v597_v34 = vmul.f32 %v1532_v33, %v593_v29  ;;  %v598_v35 = vmul.f32 %v1532_v33, %v594_v30 }
 0x1d3   : > { %v603_v37 = vmul.f32 %v602_v32, %v597_v34  ;;  %v604_v38 = vmul.f32 %v602_v32, %v598_v35  ;;  %v2127_v35 = vld [vmem:[%s2261_s28] sm:$0x3f] (!%p1270_p4) }
 0x1d5   : > { %v609_v39 = vadd.f32 %v608_v36, %v603_v37  ;;  %v610_v40 = vadd.f32 %v608_v36, %v604_v38  ;;  %v859_v37 = vrot.slane (!%p1270_p4), %v2127_v35, %v601_v27  ;;  %v1542_v27 = vld [vmem:[%s2262_s6 + $0x8] sm:$0xff] (!%p1270_p4)  }
 0x1d7   : > { %v611_v41 = vpack.c.bf16 %v610_v40, %v609_v39  ;;  %v864_v40 = vrot.slane (!%p1270_p4), %v2127_v35, %v607_v31  ;;  %v1543_v31 = vld [vmem:[%s2262_s6 + $0x10] sm:$0xff] (!%p1270_p4)  }
 0x1d9   : > { %1371 = vmatmul.mubr.bf16.vlgmr.msra.gmra.mrb[0].mxu0 %v611_v41 }
 0x1da   : > { %1382 = vmatprep.mubr.msk.bf16.mxu0 (!%p1270_p4), %vm1785_vm3, %v1784_v60 }
 0x2ac   : > { %v710_v42 = vpop.f32.mrb[0].mxu0 }
 0x2ad   : > { %v1372_v43 = vpop.f32.mrb[1].mxu0 }
 0x2ae   : > { %v713_v44 = vpop.f32.mrb[2].mxu0 }
 0x2af   : > { %v719_v45 = vpack.c.bf16 %v713_v44, %v710_v42  ;;  %v1373_v46 = vpop.f32.mrb[3].mxu0  ;;  %v1541_v44 = vld [vmem:[%s2262_s6] sm:$0xff] (!%p1270_p4)  }
 0x2b0   : > { %v1545_v46 = vld [vmem:[%s2262_s6 + $0x20] sm:$0xff] (!%p1270_p4)  }
 0x2b1   : > { %1375 = vmatpush3.bf16.msra.mxu1 %v719_v45  ;;  %v1544_v45 = vld [vmem:[%s2262_s6 + $0x18] sm:$0xff] (!%p1270_p4)  }
 0x2b2   : > { %1386 = vmatprep.subr.bf16.mxu1 (!%p1270_p4), %v1784_v60 }
 0x2b4   : > { %1377 = vmatmul.mubr.msk.bf16.vlgmr.msra.gmra.mrb[0].mxu1 %vm729_vm2, %v1530_v47  ;;  %v1546_v47 = vld [vmem:[%s2262_s6 + $0x28] sm:$0xff] (!%p1270_p4)  }
 0x2b5   : > { %1402 = vmatprep.mubr.msk.bf16.mxu1 (!%p1270_p4), %vm1785_vm3, %v1784_v60  ;;  %1387 = vmatpush3.bf16.msra.mxu1 (!%p1270_p4), %v1533_v63 }
 0x2b6   : > { %1388 = vmatprep.subr.bf16.mxu1 (!%p1270_p4), %v1784_v60 }
 0x2b9   : > { %1389 = vmatpush3.bf16.msra.mxu1 (!%p1270_p4), %v1534_v0 }
 0x2ba   : > { %1390 = vmatprep.subr.bf16.mxu1 (!%p1270_p4), %v1784_v60 }
 0x2bd   : > { %1391 = vmatpush3.bf16.msra.mxu1 (!%p1270_p4), %v1535_v1 }
 0x2be   : > { %1392 = vmatprep.subr.bf16.mxu1 (!%p1270_p4), %v1784_v60 }
 0x2c1   : > { %1393 = vmatpush3.bf16.msra.mxu1 (!%p1270_p4), %v1536_v2 }
 0x2c2   : > { %1394 = vmatprep.subr.bf16.mxu1 (!%p1270_p4), %v1784_v60 }
 0x2c5   : > { %1395 = vmatpush3.bf16.msra.mxu1 (!%p1270_p4), %v1537_v3 }
 0x2c6   : > { %1396 = vmatprep.subr.bf16.mxu1 (!%p1270_p4), %v1784_v60 }
 0x2c9   : > { %1397 = vmatpush3.bf16.msra.mxu1 (!%p1270_p4), %v1538_v4 }
 0x2ca   : > { %1398 = vmatprep.subr.bf16.mxu1 (!%p1270_p4), %v1784_v60 }
 0x2cd   : > { %1399 = vmatpush3.bf16.msra.mxu1 (!%p1270_p4), %v1539_v5 }
 0x2ce   : > { %1400 = vmatprep.subr.bf16.mxu1 (!%p1270_p4), %v1784_v60 }
 0x2d1   : > { %1401 = vmatpush3.bf16.msra.mxu1 (!%p1270_p4), %v1540_v6 }
 0x387   : > { %v767_v50 = vpop.f32.mrb[0].mxu1 }
 0x388   : > { %v768_v51 = vadd.f32 %v767_v50, %v723_v49  ;;  %v1378_v52 = vpop.f32.mrb[1].mxu1  ;;  %781 = sbr.rel (%p1270_p4) target bundleno = 1966 (0x7ae), region = 84  ;;  %v1548_v50 = vld [vmem:[%s2262_s6 + $0x38] sm:$0xff] (!%p1270_p4)  }
 0x389   : > { %v770_v53 = vpop.f32.mrb[2].mxu1 }
 0x38a   : > { %v774_v54 = vmax.f32 %v768_v51, 0.0  ;;  %v771_v55 = vadd.f32 %v770_v53, %v723_v49  ;;  %v1379_v56 = vpop.f32.mrb[3].mxu1  ;;  %v1547_v49 = vld [vmem:[%s2262_s6 + $0x30] sm:$0xff] (!%p1270_p4)   ;;  %v886_v51 = vrot.slane (!%p1270_p4), %v2127_v35, %v722_v48 }
 0x38c   : > { %776 = vst [vmem:[#allocation2] sm:$0xff] %v774_v54  ;;  %v775_v57 = vmax.f32 %v771_v55, 0.0 }
 0x38e   : > { %777 = vst [vmem:[#allocation2 + $0x8] sm:$0xff] %v775_v57 }
 0x393   : > { %v784_v58 = vld [vmem:[#allocation2] sm:$0xff] }
 0x395   : > { %v785_v59 = vld [vmem:[#allocation2 + $0x8] sm:$0xff] }
 0x396   : > { %v786_v61 = vpack.c.bf16 %v785_v59, %v784_v58 }
 0x398   : > { %1381 = vmatpush3.bf16.msra.mxu0 %v786_v61 }
 0x399   : > { %1406 = vmatprep.subr.bf16.mxu0 %v1784_v60 }
 0x39b   : > { %1383 = vmatmul.mubr.msk.bf16.vlgmr.msra.gmra.mrb[0].mxu0 %vm729_vm2, %v783_v62 }
 0x39c   : > { %1422 = vmatprep.mubr.msk.bf16.mxu0 %vm1785_vm3, %v1784_v60  ;;  %1407 = vmatpush3.bf16.msra.mxu0 %v1541_v44 }
 0x39d   : > { %1408 = vmatprep.subr.bf16.mxu0 %v1784_v60 }
 0x3a0   : > { %1409 = vmatpush3.bf16.msra.mxu0 %v1542_v27 }
 0x3a1   : > { %1410 = vmatprep.subr.bf16.mxu0 %v1784_v60 }
 0x3a4   : > { %1411 = vmatpush3.bf16.msra.mxu0 %v1543_v31 }
 0x3a5   : > { %1412 = vmatprep.subr.bf16.mxu0 %v1784_v60 }
 0x3a8   : > { %1413 = vmatpush3.bf16.msra.mxu0 %v1544_v45 }
 0x3a9   : > { %1414 = vmatprep.subr.bf16.mxu0 %v1784_v60 }
 0x3ac   : > { %1415 = vmatpush3.bf16.msra.mxu0 %v1545_v46 }
 0x3ad   : > { %1416 = vmatprep.subr.bf16.mxu0 %v1784_v60 }
 0x3b0   : > { %1417 = vmatpush3.bf16.msra.mxu0 %v1546_v47 }
 0x3b1   : > { %1418 = vmatprep.subr.bf16.mxu0 %v1784_v60 }
 0x3b4   : > { %1419 = vmatpush3.bf16.msra.mxu0 %v1547_v49 }
 0x3b5   : > { %1420 = vmatprep.subr.bf16.mxu0 %v1784_v60 }
 0x3b8   : > { %1421 = vmatpush3.bf16.msra.mxu0 %v1548_v50 }
 0x46e   : > { %v824_v7 = vpop.f32.mrb[0].mxu0 }
 0x46f   : > { %v831_v8 = vsel %vm830_vm4, %v824_v7, 0.0  ;;  %v840_v9 = vmul.f32 %v824_v7, %v824_v7  ;;  %v1384_v10 = vpop.f32.mrb[1].mxu0 }
 0x470   : > { %v832_v11 = vrot.slane %v831_v8, 4  ;;  %v827_v12 = vpop.f32.mrb[2].mxu0 }
 0x471   : > { %v841_v13 = vsel %vm830_vm4, %v840_v9, 0.0  ;;  %v1385_v14 = vpop.f32.mrb[3].mxu0 }
 0x472   : > { %v833_v15 = vadd.f32 %v832_v11, %v831_v8  ;;  %v842_v16 = vrot.slane %v841_v13, 4  ;;  %v1002_v14 = vsub.s32 3, %v2091_v26 }
 0x474   : > { %v834_v17 = vrot.slane %v833_v15, 2  ;;  %v843_v18 = vadd.f32 %v842_v16, %v841_v13 }
 0x476   : > { %v835_v19 = vadd.f32 %v834_v17, %v833_v15  ;;  %v844_v20 = vrot.slane %v843_v18, 2  ;;  %v1007_v15 = vsub.s32 4, %v2091_v26  ;;  %v1003_v17 = vrot.slane %v2127_v35, %v1002_v14 }
 0x478   : > { %v836_v21 = vrot.slane %v835_v19, 1  ;;  %v845_v22 = vadd.f32 %v844_v20, %v843_v18  ;;  %v1008_v20 = vrot.slane %v2127_v35, %v1007_v15 }
 0x47a   : > { %v837_v23 = vadd.f32 %v836_v21, %v835_v19  ;;  %v846_v24 = vrot.slane %v845_v22, 1 }
 0x47c   : > { %v839_v25 = vmul.f32 0.5, %v837_v23  ;;  %v847_v28 = vadd.f32 %v846_v24, %v845_v22  ;;  %v1029_v24 = vsub.s32 5, %v2091_v26 }
 0x47e   : > { %v848_v29 = vmul.f32 0.5, %v847_v28  ;;  %v849_v30 = vmul.f32 %v839_v25, %v839_v25  ;;  %v852_v36 = vsub.f32 %v824_v7, %v839_v25  ;;  %v1030_v25 = vrot.slane %v2127_v35, %v1029_v24 }
 0x480   : > { %v850_v32 = vsub.f32 %v848_v29, %v849_v30 }
 0x482   : > { %v851_v33 = vmax.f32 %v850_v32, 0.0 }
 0x484   : > { %v853_v34 = vadd.f32 1e-05, %v851_v33 }
 0x486   : > { %1549 = vrsqrt.f32 %v853_v34 }
 0x490   : > { %v1550_v38 = vpop.eup %1549 }
 0x491   : > { %v855_v39 = vmul.f32 %v1550_v38, %v852_v36 }
 0x493   : > { %v860_v41 = vmul.f32 %v859_v37, %v855_v39 }
 0x495   : > { %v865_v42 = vadd.f32 %v864_v40, %v860_v41 }
 0x497   : > { %v866_v43 = vpack.c.bf16 %v865_v42, %v865_v42 }
 0x499   : > { %1403 = vmatmul.mubr.bf16.vlgmr.msra.gmra.mrb[0].mxu1 %v866_v43 }
 0x56c   : > { %v969_v52 = vpop.f32.mrb[0].mxu1 }
 0x56d   : > { %v970_v53 = vadd.f32 %v969_v52, %v886_v51  ;;  %v1404_v54 = vpop.f32.mrb[1].mxu1 }
 0x56e   : > { %v972_v55 = vpop.f32.mrb[2].mxu1 }
 0x56f   : > { %v975_v56 = vmax.f32 %v970_v53, 0.0  ;;  %v1405_v57 = vpop.f32.mrb[3].mxu1 }
 0x571   : > { %v976_v58 = vsel %vm830_vm4, %v975_v56, 0.0  ;;  %v984_v59 = vmul.f32 %v975_v56, %v975_v56 }
 0x572   : > { %v977_v61 = vrot.slane %v976_v58, 4 }
 0x573   : > { %v985_v60 = vsel %vm830_vm4, %v984_v59, 0.0 }
 0x574   : > { %v978_v62 = vadd.f32 %v977_v61, %v976_v58  ;;  %v986_v63 = vrot.slane %v985_v60, 4 }
 0x576   : > { %v979_v0 = vrot.slane %v978_v62, 2  ;;  %v987_v1 = vadd.f32 %v986_v63, %v985_v60 }
 0x578   : > { %v980_v2 = vadd.f32 %v979_v0, %v978_v62  ;;  %v988_v3 = vrot.slane %v987_v1, 2 }
 0x57a   : > { %v981_v4 = vrot.slane %v980_v2, 1  ;;  %v989_v48 = vadd.f32 %v988_v3, %v987_v1 }
 0x57c   : > { %v982_v5 = vadd.f32 %v981_v4, %v980_v2  ;;  %v990_v6 = vrot.slane %v989_v48, 1 }
 0x57e   : > { %v983_v7 = vmul.f32 0.5, %v982_v5  ;;  %v991_v8 = vadd.f32 %v990_v6, %v989_v48 }
 0x580   : > { %v992_v9 = vmul.f32 0.5, %v991_v8  ;;  %v993_v10 = vmul.f32 %v983_v7, %v983_v7  ;;  %v996_v16 = vsub.f32 %v975_v56, %v983_v7 }
 0x582   : > { %v994_v11 = vsub.f32 %v992_v9, %v993_v10 }
 0x584   : > { %v995_v12 = vmax.f32 %v994_v11, 0.0 }
 0x586   : > { %v997_v13 = vadd.f32 1e-05, %v995_v12 }
 0x588   : > { %1551 = vrsqrt.f32 %v997_v13 }
 0x592   : > { %v1552_v18 = vpop.eup %1551 }
 0x593   : > { %v999_v19 = vmul.f32 %v1552_v18, %v996_v16 }
 0x595   : > { %v1004_v21 = vmul.f32 %v1003_v17, %v999_v19 }
 0x597   : > { %v1009_v22 = vadd.f32 %v1008_v20, %v1004_v21 }
 0x599   : > { %v1010_v23 = vpack.c.bf16 %v1009_v22, %v1009_v22 }
 0x59b   : > { %1423 = vmatmul.mubr.bf16.vlgmr.msra.gmra.mrb[4].mxu0 %v1010_v23 }
 0x66e   : > { %v1113_v28 = vpop.f32.mrb[4].mxu0 }
 0x66f   : > { %v1114_v29 = vadd.f32 %v1113_v28, %v1030_v25  ;;  %v1424_v30 = vpop.f32.mrb[5].mxu0 }
 0x670   : > { %v1116_v32 = vpop.f32.mrb[6].mxu0 }
 0x671   : > { %v1425_v33 = vpop.f32.mrb[7].mxu0  ;;  %v1120_v34 = vsel %vm1119_vm5, %v1114_v29, -inf }
 0x672   : > { %1121 = vmax.xlane.f32.xlu0 %v1120_v34 }
 0x6ff   : > { %v1122_v36 = vpop.xlane.xlu0 %1121 }
 0x700   : > { %v1123_v37 = vsub.f32 %v1114_v29, %v1122_v36 }
 0x702   : > { %v1124_v38 = vmul.f32 1.442695, %v1123_v37 }
 0x704   : > { %1553 = vpow2.f32 %v1124_v38 }
 0x70e   : > { %v1554_v39 = vpop.eup %1553 }
 0x70f   : > { %v1126_v40 = vsel %vm1119_vm5, %v1554_v39, 0.0 }
 0x710   : > { %1127 = vadd.xlane.f32.xlu0 %v1126_v40 }
 0x79d   : > { %v1128_v26 = vpop.xlane.xlu0 %1127 }
 0x79e   : > { %1555 = vlog2.f32 %v1128_v26 }
 0x7a8   : > { %v1556_v35 = vpop.eup %1555 }
 0x7a9   : > { %v1130_v41 = vmul.f32 0.6931472, %v1556_v35 }
 0x7ab   : > { %v1131_v42 = vsub.f32 %v1123_v37, %v1130_v41 }
 0x7ad   : > { %1132 = vst.msk [vmem:[#allocation11] sm:$0x3] %vm1119_vm5, %v1131_v42 }
 0x7ae PF: > { %p1465_p2 = scmp.eq.s32.totalorder %s1861_s17, 2  ;;  %s1786_s26 = smov [#allocation11]  }
 0x7af   : > { %s1140_s19 = sshll.u32 %s1786_s26, 4  ;;  %s1141_s19 = int_to_ptr.vmem [resolvable:$true] %s1140_s19 }
 0x7b0   : > { %s1693_s7 = scalar_lea.vmem %s1141_s19, 32  ;;  %p1700_p13 = scmp.lt.s32.totalorder %s1141_s19, %s1141_s19 }
 0x7b1   : > { %p1694_p6 = scmp.ne.s32.totalorder %s1141_s19, %s1693_s7  ;;  %p1701_p12 = scmp.lt.s32.totalorder %s1693_s7, %s1693_s7 }
 0x7b3   : > { %p1695_p7 = pnand %p1694_p6, %p1465_p2  ;;  %p1702_p8 = por %p1701_p12, %p1700_p13 }
 0x7b5   : > { %p1696_p11 = pneg %p1695_p7 }
 0x7b7   : > { %p1703_p10 = pnand %p1702_p8, %p1696_p11 }
 0x7b9   : > { %1706 = shalt.err (!%p1703_p10)
}
 0x7ba   : > { %s2263_s24 = sld [smem:[#allocation28_spill]] }
 0x7c0   : > { %s1707_s10 = scalar_lea.hbm %s2263_s24, 32 }
 0x7c1   : > { %p1708_p0 = scmp.ne.s32.totalorder %s2263_s24, %s1707_s10  ;;  %p1713_p1 = scmp.lt.u32.totalorder %s1707_s10, %s2263_s24 }
 0x7c3   : > { %p1709_p5 = pnand %p1708_p0, %p1465_p2 }
 0x7c5   : > { %p1710_p9 = pneg %p1709_p5 }
 0x7c7   : > { %p1715_p3 = pnand %p1713_p1, %p1710_p9 }
 0x7c9   : > { %1718 = shalt.err (!%p1715_p3)
}
 0x7ca   : > { %1441 = dma.vmem_to_hbm [thread:$0]  (%p1465_p2), %s1141_s19, 32, %s2263_s24, [#allocation6]  }
 0x7cb   : > { %1754 = dma.done.wait (%p1465_p2), [#allocation6], 32  }
 0x7cc   : > { %1756 = vsyncadd (%p1465_p2), [#allocation6], 4294967264 }
 0x7cd PF: > { %s2264_s16 = sld [smem:[#allocation22_spill]]  ;;  %s2265_s25 = sld [smem:[#allocation23_spill]] }
 0x7ce   : > { %s2266_s13 = smov %s1763_s14  ;;  %s2267_s14 = smov %s1767_s15 }
 0x7d3   : > { %p20_p4 = scmp.ge.s32.totalorder %s2264_s16, 5   ;;  %s2268_s15 = smov %s2265_s25 }
 0x7d5   :  { %22 = sbr.rel (!%p20_p4) target bundleno = 10 (0xa), region = 119 }
 0x7dc   :  { %1153 = vsyncpa [#allocation5], 1 }
 0x7dd   :  { %1155 = vsyncpa [#allocation5 + $0x1], 1 }
 0x7de   :  { %1156 = vsyncpa [#allocation8], 1 }
 0x7df   :  { %1157 = vsyncpa [#allocation6], 1 }
 0x7e0   :  { %1159 = vsyncpa [#allocation6 + $0x1], 1 }
 0x7e1   :  { %1160 = vsyncmov [#allocation3] }
 0x7e4   :  { %s1161_s17 = vpop.sfrf %1160 }
 0x7e5   :  { %p1292_p2 = scmp.ne.s32.totalorder %s1161_s17, 0 }
 0x7e7   :  { %1165 = shalt.err (%p1292_p2)  }

// kernel: tpu_custom_call.1
= control target key start
LH: loop header
LB: loop body
LE: loop exit
PB: predicated region body
PF: predicated region fallthrough
CT: control target
= control target key end

     0   :  { %s2216_s0 = inlined_call_operand.hbm [shape: f32[16,128], index: 0, kind: input, shape index: {}]   ;;  %s2217_s1 = inlined_call_operand.hbm [shape: bf16[16,16], index: 1, kind: input, shape index: {}]   ;;  %s2218_s2 = inlined_call_operand.hbm [shape: f32[2,128], index: 2, kind: input, shape index: {}]   ;;  %s2219_s3 = inlined_call_operand.vmem [shape: bf16[128,128], index: 3, kind: input, shape index: {}]   ;;  %s2220_s4 = inlined_call_operand.vmem [shape: f32[3,3,128], index: 4, kind: input, shape index: {}]   ;;  %s2221_s5 = inlined_call_operand.hbm [shape: bf16[3,128,128], index: 5, kind: input, shape index: {}]   ;;  %s2222_s6 = inlined_call_operand.vmem [shape: bf16[2,16], index: 6, kind: input, shape index: {}]   ;;  %s2223_s7 = inlined_call_operand.vmem [shape: f32[6,128], index: 7, kind: input, shape index: {}]   ;;  %s2224_s8 = inlined_call_operand.hbm [shape: bf16[1,128,128], index: 8, kind: input, shape index: {}]   ;;  %s2225_s9 = inlined_call_operand.vmem [shape: bf16[128,4], index: 9, kind: input, shape index: {}]   ;;  %s2226_s10 = inlined_call_operand.hbm [shape: f32[2,4], index: 10, kind: output, shape index: {}]  }
   0x1   :  { %2236 = sst [smem:[#allocation24_spill]] %s2219_s3 }
   0x2   :  { %2237 = sst [smem:[#allocation25_spill]] %s2222_s6 }
   0x3   :  { %2238 = sst [smem:[#allocation26_spill]] %s2223_s7 }
   0x4   :  { %2239 = sst [smem:[#allocation27_spill]] %s2225_s9 }
   0x5   :  { %2240 = sst [smem:[#allocation28_spill]] %s2226_s10 }
   0x6   :  { %15 = vsyncpa [#allocation5], 0 }
   0x7   :  { %16 = vsyncpa [#allocation8], 0 }
   0x8   :  { %17 = vsyncpa [#allocation6], 0  ;;  %s1842_s13 = smov 0   ;;  %s1844_s14 = smov 0  }
   0x9   :  { %s1846_s15 = smov 0   ;;  %s1848_s16 = smov 0  }
   0xa LB: > { %s1861_s17 = sadd.s32 4294967295, %s1771_s16   ;;  %s1864_s18 = sadd.s32 1, %s1771_s16   ;;  %s1771_s16 = sphi %s1848_s16, %s2264_s16   ;;  %s1767_s15 = sphi %s1846_s15, %s2268_s15   ;;  %s1763_s14 = sphi %s1844_s14, %s2267_s14   ;;  %s1759_s13 = sphi %s1842_s13, %s2266_s13  }
   0xb   : > { %2241 = sst [smem:[#allocation22_spill]] %s1864_s18  ;;  %s116_s19 = ssub.s32 %s1771_s16, %s1864_s18 }
   0xc   : > { %s119_s20 = sadd.s32 1, %s1767_s15  ;;  %p117_p0 = scmp.eq.s32.totalorder %s116_s19, 0 }
   0xd   : > { %p126_p1 = scmp.ne.s32.totalorder %s1767_s15, %s1763_s14  ;;  %p127_p2 = scmp.eq.s32.totalorder %s1771_s16, 0 }
   0xe   : > { %p132_p3 = scmp.ne.s32.totalorder %s1763_s14, %s1759_s13  ;;  %p2227_p5 = scmp.eq.s32.totalorder %s1861_s17, 0 }
   0xf   : > { %s1874_s21 = scalar_select %p117_p0, %s1767_s15, %s119_s20  }
  0x10   : > { %p1876_p4 = por %p127_p2, %p126_p1  ;;  %p1237_p6 = scmp.ge.s32.totalorder %s1771_s16, 1 }
  0x11   : > { %2242 = sst [smem:[#allocation23_spill]] %s1874_s21  ;;  %p248_p7 = scmp.lt.s32.totalorder %s1771_s16, 4 }
  0x12   : > { %p1885_p8 = por %p2227_p5, %p132_p3  ;;  %s1773_s25 = smov [#allocation4]  }
  0x13   : > { %p1890_p10 = pnand %p1237_p6, %p248_p7  ;;  %s260_s26 = sshll.u32 %s1773_s25, 4  ;;  %s261_s26 = int_to_ptr.vmem [resolvable:$true] %s260_s26 }
  0x14   : > { %s2244_s23 = scalar_select %p1885_p8, 1, 0 }
  0x15   : > { %s2245_s24 = scalar_select %p1890_p10, 1, 0 }
  0x16   : > { %p1444_p11 = pneg %p1890_p10  ;;  %p1461_p13 = scmp.lt.s32.totalorder %s1771_s16, 3 }
  0x17   : > { %s1557_s11 = scalar_lea.hbm %s2217_s1, 128 }
  0x18   : > { %p1898_p12 = pnand %p1444_p11, %p2227_p5  ;;  %p1905_p0 = pnand %p1461_p13, %p1876_p4 }
  0x19   : > { %p1558_p1 = scmp.ne.s32.totalorder %s2217_s1, %s1557_s11  ;;  %p1564_p6 = scmp.lt.u32.totalorder %s1557_s11, %s2217_s1 }
  0x1a   : > { %s2247_s28 = scalar_select %p1905_p0, 1, 0 }
  0x1b   : > { %p1917_p2 = pneg %p1898_p12 }
  0x1d   : > { %p1560_p3 = pnand %p1917_p2, %p1558_p1 }
  0x1f   : > { %p1561_p4 = pneg %p1560_p3 }
  0x21   : > { %p1566_p7 = pnand %p1564_p6, %p1561_p4 }
  0x23   : > { %1569 = shalt.err (!%p1566_p7)
}
  0x24   : > { %s1570_s25 = scalar_lea.vmem %s261_s26, 128  ;;  %p1578_p5 = scmp.lt.s32.totalorder %s261_s26, %s261_s26 }
  0x25   : > { %p1571_p11 = scmp.ne.s32.totalorder %s261_s26, %s1570_s25  ;;  %p1579_p8 = scmp.lt.s32.totalorder %s1570_s25, %s1570_s25 }
  0x27   : > { %p1573_p13 = pnand %p1571_p11, %p1917_p2  ;;  %p1580_p10 = por %p1579_p8, %p1578_p5 }
  0x29   : > { %p1574_p9 = pneg %p1573_p13 }
  0x2b   : > { %p1581_p0 = pnand %p1580_p10, %p1574_p9 }
  0x2d   : > { %1584 = shalt.err (!%p1581_p0)
}
  0x2e   : > { %s1774_s29 = smov 64   ;;  %s1775_s30 = smov 4  }
  0x2f   : > { %1447 = dma.hbm_to_vmem [thread:$0]  (!%p1898_p12), %s2217_s1, 128, %s261_s26, [#allocation5], %s1774_s29, %s1774_s29, %s1775_s30  }
  0x30   : > { %s1776_s13 = smov [#allocation7]   ;;  %s1777_s22 = smov [#allocation10]  }
  0x31   : > { %s274_s20 = sshll.u32 %s1776_s13, 4  ;;  %s293_s25 = sshll.u32 %s1777_s22, 4  ;;  %s275_s20 = int_to_ptr.vmem [resolvable:$true] %s274_s20  ;;  %s294_s25 = int_to_ptr.vmem [resolvable:$true] %s293_s25 }
  0x32   : > { %s1585_s10 = scalar_lea.hbm %s2218_s2, 32 }
  0x33   : > { %p1586_p5 = scmp.ne.s32.totalorder %s2218_s2, %s1585_s10  ;;  %p1592_p10 = scmp.lt.u32.totalorder %s1585_s10, %s2218_s2 }
  0x35   : > { %p1588_p8 = pnand %p1586_p5, %p1917_p2 }
  0x37   : > { %p1589_p9 = pneg %p1588_p8 }
  0x39   : > { %p1594_p0 = pnand %p1592_p10, %p1589_p9 }
  0x3b   : > { %1597 = shalt.err (!%p1594_p0)
}
  0x3c   : > { %s1598_s26 = scalar_lea.vmem %s275_s20, 32  ;;  %p1606_p6 = scmp.lt.s32.totalorder %s275_s20, %s275_s20 }
  0x3d   : > { %p1599_p1 = scmp.ne.s32.totalorder %s275_s20, %s1598_s26  ;;  %p1607_p7 = scmp.lt.s32.totalorder %s1598_s26, %s1598_s26 }
  0x3f   : > { %p1601_p3 = pnand %p1599_p1, %p1917_p2  ;;  %p1608_p11 = por %p1607_p7, %p1606_p6 }
  0x41   : > { %p1602_p4 = pneg %p1601_p3 }
  0x43   : > { %p1609_p13 = pnand %p1608_p11, %p1602_p4 }
  0x45   : > { %1612 = shalt.err (!%p1609_p13)
}
  0x46   : > { %1450 = dma.hbm_to_vmem [thread:$0]  (!%p1898_p12), %s2218_s2, 32, %s275_s20, [#allocation8]  }
  0x47   : > { %s317_s3 = sand.u32 1, %s1771_s16   ;;  %s1613_s18 = scalar_lea.hbm %s2224_s8, 1024 }
  0x48   : > { %p1614_p5 = scmp.ne.s32.totalorder %s2224_s8, %s1613_s18  ;;  %p1620_p10 = scmp.lt.u32.totalorder %s1613_s18, %s2224_s8 }
  0x4a   : > { %p1616_p8 = pnand %p1614_p5, %p1917_p2 }
  0x4c   : > { %p1617_p9 = pneg %p1616_p8 }
  0x4e   : > { %p1622_p0 = pnand %p1620_p10, %p1617_p9 }
  0x50   : > { %1625 = shalt.err (!%p1622_p0)
}
  0x51   : > { %s1626_s20 = scalar_lea.vmem %s294_s25, 1024  ;;  %p1634_p6 = scmp.lt.s32.totalorder %s294_s25, %s294_s25 }
  0x52   : > { %p1627_p1 = scmp.ne.s32.totalorder %s294_s25, %s1626_s20  ;;  %p1635_p7 = scmp.lt.s32.totalorder %s1626_s20, %s1626_s20 }
  0x54   : > { %p1629_p3 = pnand %p1627_p1, %p1917_p2  ;;  %p1636_p11 = por %p1635_p7, %p1634_p6 }
  0x56   : > { %p1630_p4 = pneg %p1629_p3 }
  0x58   : > { %p1637_p13 = pnand %p1636_p11, %p1630_p4 }
  0x5a   : > { %1640 = shalt.err (!%p1637_p13)
}
  0x5b   : > { %1453 = dma.hbm_to_vmem [thread:$0]  (!%p1898_p12), %s2224_s8, 1024, %s294_s25, [#allocation8], %s1774_s29, %s1774_s29, %s1775_s30  }
  0x5c   : > { %s319_s19 = sand.u32 1, %s1767_s15   ;;  %s1293_s9 = sshll.u32 %s1771_s16, 10 }
  0x5d   : > { %s1242_s7 = sshll.u32 %s319_s19, 6  ;;  %s1981_s18 = scalar_lea.hbm %s2221_s5, %s1293_s9 }
  0x5e   : > { %s321_s27 = scalar_lea.vmem [#allocation9], %s1242_s7  ;;  %s1985_s11 = scalar_lea.sflag [#allocation5], %s317_s3 }
  0x5f   : > { %s328_s21 = sshll.u32 %s321_s27, 4  ;;  %s1641_s12 = scalar_lea.hbm %s1981_s18, 1024  ;;  %s1983_s21 = int_to_ptr.vmem [resolvable:$true] %s328_s21 }
  0x60   : > { %p1642_p12 = scmp.ne.s32.totalorder %s1981_s18, %s1641_s12  ;;  %p2249_p2 = scmp.ne.s32.totalorder %s2247_s28, 0 }
  0x61   : > { %s1646_s13 = scalar_lea.hbm %s2221_s5, 3072  ;;  %p1647_p10 = scmp.lt.u32.totalorder %s1981_s18, %s2221_s5 }
  0x62   : > { %p1643_p5 = pneg %p2249_p2  ;;  %p1648_p0 = scmp.lt.u32.totalorder %s1646_s13, %s1641_s12 }
  0x63   : > { %p1650_p3 = scmp.lt.u32.totalorder %s1641_s12, %s1981_s18 }
  0x64   : > { %p1644_p8 = pnand %p1643_p5, %p1642_p12  ;;  %p1649_p1 = por %p1648_p0, %p1647_p10 }
  0x66   : > { %p1645_p9 = pneg %p1644_p8  ;;  %p1651_p4 = por %p1650_p3, %p1649_p1 }
  0x68   : > { %p1652_p6 = pnand %p1651_p4, %p1645_p9 }
  0x6a   : > { %1655 = shalt.err (!%p1652_p6)
}
  0x6b   : > { %s1656_s3 = scalar_lea.vmem %s1983_s21, 1024  ;;  %s1778_s26 = smov [#allocation9]  }
  0x6c   : > { %p1657_p7 = scmp.ne.s32.totalorder %s1983_s21, %s1656_s3  ;;  %s1661_s19 = sshll.u32 %s1778_s26, 4  ;;  %s1662_s19 = int_to_ptr.vmem [resolvable:$false] %s1661_s19 }
  0x6d   : > { %s1663_s7 = scalar_lea.vmem %s1662_s19, 2048  ;;  %p1664_p12 = scmp.lt.s32.totalorder %s1983_s21, %s1662_s19 }
  0x6e   : > { %p1659_p11 = pnand %p1657_p7, %p1643_p5  ;;  %p1665_p8 = scmp.lt.s32.totalorder %s1663_s7, %s1656_s3 }
  0x70   : > { %p1660_p13 = pneg %p1659_p11  ;;  %p1666_p10 = por %p1665_p8, %p1664_p12 }
  0x72   : > { %p1667_p0 = pnand %p1666_p10, %p1660_p13 }
  0x74   : > { %1670 = shalt.err (!%p1667_p0)
}
  0x75   : > { %1457 = dma.hbm_to_vmem [thread:$0]  (!%p2249_p2), %s1981_s18, 1024, %s1983_s21, %s1985_s11, %s1774_s29, %s1774_s29, %s1775_s30  }
  0x76   : > { %p2250_p5 = scmp.ne.s32.totalorder %s2245_s24, 0 }
  0x77   : > { %p2251_p9 = scmp.eq.s32.totalorder (!%p2250_p5), %s1861_s17, 0 }
  0x78   : > { %340 = sbr.rel (%p2250_p5) target bundleno = 1997 (0x7cd), region = 56 }
  0x7f   : > { %1736 = dma.done.wait (%p2251_p9), [#allocation5], 128   ;;  %p2252_p1 = pmov %p2251_p9 }
  0x81   : > { %1738 = vsyncadd (%p2252_p1), [#allocation5], 4294967168  ;;  %p2253_p3 = pmov %p2252_p1 }
  0x82   : > { %p2254_p4 = pmov %p2252_p1 }
  0x83   : > { %1740 = dma.done.wait (%p2253_p3), [#allocation8], 32  }
  0x84   : > { %1742 = vsyncadd (%p2254_p4), [#allocation8], 4294967264  ;;  %s350_s28 = sand.u32 1, %s1861_s17   ;;  %s352_s29 = sand.u32 1, %s1763_s14  }
  0x85   : > { %s1248_s30 = sshll.u32 %s352_s29, 6  ;;  %s351_s24 = scalar_lea.sflag [#allocation5], %s350_s28 }
  0x86   : > { %s2028_s9 = scalar_lea.vmem [#allocation9], %s1248_s30  ;;  %p2255_p2 = scmp.ne.s32.totalorder %s2244_s23, 0 }
  0x88   : > { %1744 = dma.done.wait (%p2255_p2), %s351_s24, 1024  }
  0x89   : > { %1746 = vsyncadd (%p2255_p2), %s351_s24, 4294966272  ;;  %p2256_p6 = pmov %p2252_p1 }
  0x8a   : > { %p2257_p7 = pmov %p2252_p1 }
  0x8b   : > { %1748 = dma.done.wait (%p2256_p6), [#allocation8], 1024  }
  0x8c   : > { %1750 = vsyncadd (%p2257_p7), [#allocation8], 4294966272  ;;  %p392_p11 = scmp.lt.s32.totalorder %s1861_s17, 2  ;;  %p2258_p13 = scmp.ne.s32.totalorder %s1861_s17, 0 }
  0x8d   : > { %s1779_s23 = smov (!%p2258_p13), [#allocation2]   ;;  %s1671_s25 = scalar_lea.hbm (!%p2258_p13), %s2216_s0, 256 }
  0x8e   : > { %s393_s6 = scalar_select %p392_p11, %s1861_s17, 2 }
  0x8f   : > { %400 = sbr.rel (%p2258_p13) target bundleno = 423 (0x1a7), region = 76  ;;  %s408_s11 = sshll.u32 (!%p2258_p13), %s1779_s23, 4  ;;  %s409_s11 = int_to_ptr.vmem [resolvable:$true] %s408_s11 }
  0x90   : > { %s1250_s10 = sshll.u32 %s393_s6, 2  ;;  %p1672_p12 = scmp.ne.s32.totalorder (!%p2258_p13), %s2216_s0, %s1671_s25 }
  0x91   : > { %s2043_s21 = scalar_lea.vmem %s2220_s4, %s1250_s10  ;;  %p1675_p8 = scmp.lt.u32.totalorder (!%p2258_p13), %s1671_s25, %s2216_s0 }
  0x93   : > { %p1677_p10 = pnand (!%p2258_p13), %p1675_p8, %p1672_p12 }
  0x96   : > { %1680 = shalt.err (!%p1677_p10)  }
  0x97   : > { %s1681_s26 = scalar_lea.vmem %s409_s11, 256  ;;  %p1686_p5 = scmp.lt.s32.totalorder %s409_s11, %s409_s11 }
  0x98   : > { %p1682_p0 = scmp.ne.s32.totalorder %s409_s11, %s1681_s26  ;;  %p1687_p9 = scmp.lt.s32.totalorder %s1681_s26, %s1681_s26 }
  0x9a   : > { %p1688_p1 = por %p1687_p9, %p1686_p5 }
  0x9c   : > { %p1689_p3 = pnand %p1688_p1, %p1682_p0 }
  0x9e   : > { %1692 = shalt.err (!%p1689_p3)  }
  0x9f   : > { %411 = dma.hbm_to_vmem [thread:$0]  %s2216_s0, 256, %s409_s11, [#allocation3] }
  0xa0   : > { %1751 = dma.done.wait [#allocation3], 256 }
  0xa1   : > { %1752 = vsyncadd [#allocation3], 4294967040  ;;  %v1780_v0 = vmov 0.0   ;;  %vm1781_vm0 = vmmov 0   ;;  %s2259_s30 = sld [smem:[#allocation24_spill]]  ;;  %v416_v4 = vld [vmem:[#allocation2] sm:$0xff]  ;;  %v446_v32 = vlaneseq }
  0xa2   : > { %1334 = vmatprep.subr.bf16.mxu0 %v1780_v0  ;;  %1350 = vmatprep.mubr.msk.bf16.mxu0 %vm1781_vm0, %v1780_v0  ;;  %v417_v5 = vld [vmem:[#allocation2 + $0x8] sm:$0xff]  ;;  %v427_v7 = vmul.f32 %v416_v4, %v416_v4  ;;  %v415_v36 = vld [vmem:[#allocation7] sm:$0x3] }
  0xa3   : > { %v418_v6 = vadd.f32 %v417_v5, %v416_v4  ;;  %v428_v8 = vmul.f32 %v417_v5, %v417_v5  ;;  %v447_v34 = vshrl.u32 %v446_v32, 7 }
  0xa5   : > { %v419_v10 = vrot.slane %v418_v6, 4  ;;  %v429_v11 = vadd.f32 %v428_v8, %v427_v7  ;;  %v448_v35 = vsub.s32 0, %v447_v34  ;;  %v454_v39 = vsub.s32 1, %v447_v34 }
  0xa7   : > { %v1512_v1 = vld [vmem:[%s2259_s30] sm:$0xff]   ;;  %v1513_v2 = vld [vmem:[%s2259_s30 + $0x8] sm:$0xff]   ;;  %v1514_v3 = vld [vmem:[%s2259_s30 + $0x10] sm:$0xff]   ;;  %v420_v12 = vadd.f32 %v419_v10, %v418_v6  ;;  %v430_v13 = vrot.slane %v429_v11, 4  ;;  %v449_v40 = vrot.slane %v415_v36, %v448_v35  ;;  %v455_v44 = vrot.slane %v415_v36, %v454_v39 }
  0xa8   : > { %1335 = vmatpush3.bf16.msra.mxu0 %v1512_v1  ;;  %v1515_v9 = vld [vmem:[%s2259_s30 + $0x18] sm:$0xff]   ;;  %v1516_v14 = vld [vmem:[%s2259_s30 + $0x20] sm:$0xff]   ;;  %v1517_v19 = vld [vmem:[%s2259_s30 + $0x28] sm:$0xff]  }
  0xa9   : > { %1336 = vmatprep.subr.bf16.mxu0 %v1780_v0  ;;  %v421_v15 = vrot.slane %v420_v12, 2  ;;  %v431_v16 = vadd.f32 %v430_v13, %v429_v11  ;;  %v1518_v24 = vld [vmem:[%s2259_s30 + $0x30] sm:$0xff]   ;;  %v1519_v29 = vld [vmem:[%s2259_s30 + $0x38] sm:$0xff]  }
  0xab   : > { %v422_v17 = vadd.f32 %v421_v15, %v420_v12  ;;  %v432_v18 = vrot.slane %v431_v16, 2 }
  0xac   : > { %1337 = vmatpush3.bf16.msra.mxu0 %v1513_v2 }
  0xad   : > { %1338 = vmatprep.subr.bf16.mxu0 %v1780_v0  ;;  %v423_v20 = vrot.slane %v422_v17, 1  ;;  %v433_v21 = vadd.f32 %v432_v18, %v431_v16 }
  0xaf   : > { %v424_v22 = vadd.f32 %v423_v20, %v422_v17  ;;  %v434_v23 = vrot.slane %v433_v21, 1 }
  0xb0   : > { %1339 = vmatpush3.bf16.msra.mxu0 %v1514_v3 }
  0xb1   : > { %1340 = vmatprep.subr.bf16.mxu0 %v1780_v0  ;;  %v426_v25 = vmul.f32 0.0625, %v424_v22  ;;  %v435_v26 = vadd.f32 %v434_v23, %v433_v21 }
  0xb3   : > { %v436_v27 = vmul.f32 0.0625, %v435_v26  ;;  %v437_v28 = vmul.f32 %v426_v25, %v426_v25  ;;  %v440_v37 = vsub.f32 %v416_v4, %v426_v25  ;;  %v441_v38 = vsub.f32 %v417_v5, %v426_v25 }
  0xb4   : > { %1341 = vmatpush3.bf16.msra.mxu0 %v1515_v9 }
  0xb5   : > { %1342 = vmatprep.subr.bf16.mxu0 %v1780_v0  ;;  %v438_v30 = vsub.f32 %v436_v27, %v437_v28 }
  0xb7   : > { %v439_v31 = vmax.f32 %v438_v30, 0.0 }
  0xb8   : > { %1343 = vmatpush3.bf16.msra.mxu0 %v1516_v14 }
  0xb9   : > { %1344 = vmatprep.subr.bf16.mxu0 %v1780_v0  ;;  %v442_v33 = vadd.f32 1e-05, %v439_v31 }
  0xbb   : > { %1520 = vrsqrt.f32 %v442_v33 }
  0xbc   : > { %1345 = vmatpush3.bf16.msra.mxu0 %v1517_v19 }
  0xbd   : > { %1346 = vmatprep.subr.bf16.mxu0 %v1780_v0 }
  0xc0   : > { %1347 = vmatpush3.bf16.msra.mxu0 %v1518_v24 }
  0xc1   : > { %1348 = vmatprep.subr.bf16.mxu0 %v1780_v0 }
  0xc4   : > { %1349 = vmatpush3.bf16.msra.mxu0 %v1519_v29 }
  0xc5   : > { %v1521_v41 = vpop.eup %1520 }
  0xc6   : > { %v444_v42 = vmul.f32 %v1521_v41, %v440_v37  ;;  %v445_v43 = vmul.f32 %v1521_v41, %v441_v38 }
  0xc8   : > { %v450_v45 = vmul.f32 %v449_v40, %v444_v42  ;;  %v451_v46 = vmul.f32 %v449_v40, %v445_v43 }
  0xca   : > { %v456_v47 = vadd.f32 %v455_v44, %v450_v45  ;;  %v457_v48 = vadd.f32 %v455_v44, %v451_v46 }
  0xcc   : > { %v458_v49 = vpack.c.bf16 %v457_v48, %v456_v47 }
  0xce   : > { %1351 = vmatmul.mubr.bf16.vlgmr.msra.gmra.mrb[0].mxu0 %v458_v49 }
 0x1a1   : > { %v557_v50 = vpop.f32.mrb[0].mxu0 }
 0x1a2   : > { %v564_v51 = vmax.f32 %v557_v50, 0.0  ;;  %v1352_v52 = vpop.f32.mrb[1].mxu0 }
 0x1a3   : > { %v560_v53 = vpop.f32.mrb[2].mxu0 }
 0x1a4   : > { %566 = vst [vmem:[#allocation2] sm:$0xff] %v564_v51  ;;  %v565_v54 = vmax.f32 %v560_v53, 0.0  ;;  %v1353_v55 = vpop.f32.mrb[3].mxu0 }
 0x1a6   : > { %567 = vst [vmem:[#allocation2 + $0x8] sm:$0xff] %v565_v54 }
 0x1a7 PF: > { %v1522_v56 = vld [vmem:[%s2028_s9] sm:$0xff]   ;;  %v1782_v57 = vmov 0.0   ;;  %v1523_v58 = vld [vmem:[%s2028_s9 + $0x8] sm:$0xff]   ;;  %vm1783_vm1 = vmmov 0   ;;  %v1524_v59 = vld [vmem:[%s2028_s9 + $0x10] sm:$0xff]   ;;  %v599_v24 = vlaneseq  ;;  %vm729_vm2 = vcmask 130048  }
 0x1a8   : > { %1354 = vmatprep.subr.bf16.mxu0 %v1782_v57  ;;  %1374 = vmatprep.subr.bf16.mxu1 %v1782_v57  ;;  %v1525_v1 = vld [vmem:[%s2028_s9 + $0x18] sm:$0xff]   ;;  %v1526_v6 = vld [vmem:[%s2028_s9 + $0x20] sm:$0xff]   ;;  %v1527_v11 = vld [vmem:[%s2028_s9 + $0x28] sm:$0xff]   ;;  %p1270_p4 = scmp.ne.s32.totalorder %s1861_s17, 2 }
 0x1a9   : > { %1355 = vmatpush3.bf16.msra.mxu0 %v1522_v56  ;;  %1370 = vmatprep.mubr.msk.bf16.mxu0 %vm1783_vm1, %v1782_v57  ;;  %v1528_v16 = vld [vmem:[%s2028_s9 + $0x30] sm:$0xff]   ;;  %v1529_v21 = vld [vmem:[%s2028_s9 + $0x38] sm:$0xff]   ;;  %v2091_v26 = vshrl.u32 %v599_v24, 7  ;;  %v568_v28 = vld [vmem:[%s2043_s21] sm:$0x7]  ;;  %vm1785_vm3 = vmmov (!%p1270_p4), 0  }
 0x1aa   : > { %1356 = vmatprep.subr.bf16.mxu0 %v1782_v57  ;;  %1376 = vmatprep.mubr.msk.bf16.mxu1 %vm1783_vm1, %v1782_v57  ;;  %v1530_v47 = vld [vmem:[#allocation4] sm:$0xff]   ;;  %s2260_s26 = sld [smem:[#allocation25_spill]] (!%p1270_p4)  ;;  %vm830_vm4 = vcmask (!%p1270_p4), 1041408   ;;  %s2261_s28 = sld [smem:[#allocation26_spill]] (!%p1270_p4)  ;;  %vm1119_vm5 = vcmask (!%p1270_p4), 25600  }
 0x1ab   : > { %v569_v60 = vld [vmem:[#allocation2] sm:$0xff]  ;;  %v601_v27 = vsub.s32 0, %v2091_v26  ;;  %v607_v31 = vsub.s32 1, %v2091_v26  ;;  %v722_v48 = vsub.s32 2, %v2091_v26  ;;  %s2262_s6 = sld [smem:[#allocation27_spill]] (!%p1270_p4) }
 0x1ac   : > { %v580_v63 = vmul.f32 %v569_v60, %v569_v60 }
 0x1ad   : > { %1357 = vmatpush3.bf16.msra.mxu0 %v1523_v58  ;;  %v570_v61 = vld [vmem:[#allocation2 + $0x8] sm:$0xff]  ;;  %v602_v32 = vrot.slane %v568_v28, %v601_v27  ;;  %v608_v36 = vrot.slane %v568_v28, %v607_v31  ;;  %v723_v49 = vrot.slane %v568_v28, %v722_v48 }
 0x1ae   : > { %1358 = vmatprep.subr.bf16.mxu0 %v1782_v57  ;;  %v571_v62 = vadd.f32 %v570_v61, %v569_v60  ;;  %v581_v0 = vmul.f32 %v570_v61, %v570_v61 }
 0x1b0   : > { %v572_v2 = vrot.slane %v571_v62, 4  ;;  %v582_v3 = vadd.f32 %v581_v0, %v580_v63  ;;  %v1533_v63 = vld [vmem:[#allocation10] sm:$0xff] (!%p1270_p4)   ;;  %v1534_v0 = vld [vmem:[#allocation10 + $0x8] sm:$0xff] (!%p1270_p4)  }
 0x1b1   : > { %1359 = vmatpush3.bf16.msra.mxu0 %v1524_v59 }
 0x1b2   : > { %1360 = vmatprep.subr.bf16.mxu0 %v1782_v57  ;;  %v573_v4 = vadd.f32 %v572_v2, %v571_v62  ;;  %v583_v5 = vrot.slane %v582_v3, 4  ;;  %v783_v62 = vld [vmem:[%s2260_s26] sm:$0x1] (!%p1270_p4)  ;;  %v1536_v2 = vld [vmem:[#allocation10 + $0x18] sm:$0xff] (!%p1270_p4)  }
 0x1b4   : > { %v574_v7 = vrot.slane %v573_v4, 2  ;;  %v584_v8 = vadd.f32 %v583_v5, %v582_v3  ;;  %v1537_v3 = vld [vmem:[#allocation10 + $0x20] sm:$0xff] (!%p1270_p4)   ;;  %v1539_v5 = vld [vmem:[#allocation10 + $0x30] sm:$0xff] (!%p1270_p4)  }
 0x1b5   : > { %1361 = vmatpush3.bf16.msra.mxu0 %v1525_v1  ;;  %v1535_v1 = vld [vmem:[#allocation10 + $0x10] sm:$0xff] (!%p1270_p4)  }
 0x1b6   : > { %1362 = vmatprep.subr.bf16.mxu0 %v1782_v57  ;;  %v575_v9 = vadd.f32 %v574_v7, %v573_v4  ;;  %v585_v10 = vrot.slane %v584_v8, 2  ;;  %v1538_v4 = vld [vmem:[#allocation10 + $0x28] sm:$0xff] (!%p1270_p4)  }
 0x1b8   : > { %v576_v12 = vrot.slane %v575_v9, 1  ;;  %v586_v13 = vadd.f32 %v585_v10, %v584_v8 }
 0x1b9   : > { %1363 = vmatpush3.bf16.msra.mxu0 %v1526_v6  ;;  %v1540_v6 = vld [vmem:[#allocation10 + $0x38] sm:$0xff] (!%p1270_p4)  }
 0x1ba   : > { %1364 = vmatprep.subr.bf16.mxu0 %v1782_v57  ;;  %v577_v14 = vadd.f32 %v576_v12, %v575_v9  ;;  %v587_v15 = vrot.slane %v586_v13, 1 }
 0x1bc   : > { %v579_v17 = vmul.f32 0.0625, %v577_v14  ;;  %v588_v18 = vadd.f32 %v587_v15, %v586_v13 }
 0x1bd   : > { %1365 = vmatpush3.bf16.msra.mxu0 %v1527_v11 }
 0x1be   : > { %1366 = vmatprep.subr.bf16.mxu0 %v1782_v57  ;;  %v589_v19 = vmul.f32 0.0625, %v588_v18  ;;  %v590_v20 = vmul.f32 %v579_v17, %v579_v17  ;;  %v593_v29 = vsub.f32 %v569_v60, %v579_v17  ;;  %v594_v30 = vsub.f32 %v570_v61, %v579_v17 }
 0x1bf   : > { %v1784_v60 = vmov (!%p1270_p4), 0.0  }
 0x1c0   : > { %v591_v22 = vsub.f32 %v589_v19, %v590_v20 }
 0x1c1   : > { %1367 = vmatpush3.bf16.msra.mxu0 %v1528_v16 }
 0x1c2   : > { %1368 = vmatprep.subr.bf16.mxu0 %v1782_v57  ;;  %v592_v23 = vmax.f32 %v591_v22, 0.0 }
 0x1c4   : > { %v595_v25 = vadd.f32 1e-05, %v592_v23 }
 0x1c5   : > { %1369 = vmatpush3.bf16.msra.mxu0 %v1529_v21 }
 0x1c6   : > { %1531 = vrsqrt.f32 %v595_v25  ;;  %1380 = vmatprep.subr.bf16.mxu0 (!%p1270_p4), %v1784_v60 }
 0x1d0   : > { %v1532_v33 = vpop.eup %1531 }
 0x1d1   : > { %v597_v34 = vmul.f32 %v1532_v33, %v593_v29  ;;  %v598_v35 = vmul.f32 %v1532_v33, %v594_v30 }
 0x1d3   : > { %v603_v37 = vmul.f32 %v602_v32, %v597_v34  ;;  %v604_v38 = vmul.f32 %v602_v32, %v598_v35  ;;  %v2127_v35 = vld [vmem:[%s2261_s28] sm:$0x3f] (!%p1270_p4) }
 0x1d5   : > { %v609_v39 = vadd.f32 %v608_v36, %v603_v37  ;;  %v610_v40 = vadd.f32 %v608_v36, %v604_v38  ;;  %v859_v37 = vrot.slane (!%p1270_p4), %v2127_v35, %v601_v27  ;;  %v1542_v27 = vld [vmem:[%s2262_s6 + $0x8] sm:$0xff] (!%p1270_p4)  }
 0x1d7   : > { %v611_v41 = vpack.c.bf16 %v610_v40, %v609_v39  ;;  %v864_v40 = vrot.slane (!%p1270_p4), %v2127_v35, %v607_v31  ;;  %v1543_v31 = vld [vmem:[%s2262_s6 + $0x10] sm:$0xff] (!%p1270_p4)  }
 0x1d9   : > { %1371 = vmatmul.mubr.bf16.vlgmr.msra.gmra.mrb[0].mxu0 %v611_v41 }
 0x1da   : > { %1382 = vmatprep.mubr.msk.bf16.mxu0 (!%p1270_p4), %vm1785_vm3, %v1784_v60 }
 0x2ac   : > { %v710_v42 = vpop.f32.mrb[0].mxu0 }
 0x2ad   : > { %v1372_v43 = vpop.f32.mrb[1].mxu0 }
 0x2ae   : > { %v713_v44 = vpop.f32.mrb[2].mxu0 }
 0x2af   : > { %v719_v45 = vpack.c.bf16 %v713_v44, %v710_v42  ;;  %v1373_v46 = vpop.f32.mrb[3].mxu0  ;;  %v1541_v44 = vld [vmem:[%s2262_s6] sm:$0xff] (!%p1270_p4)  }
 0x2b0   : > { %v1545_v46 = vld [vmem:[%s2262_s6 + $0x20] sm:$0xff] (!%p1270_p4)  }
 0x2b1   : > { %1375 = vmatpush3.bf16.msra.mxu1 %v719_v45  ;;  %v1544_v45 = vld [vmem:[%s2262_s6 + $0x18] sm:$0xff] (!%p1270_p4)  }
 0x2b2   : > { %1386 = vmatprep.subr.bf16.mxu1 (!%p1270_p4), %v1784_v60 }
 0x2b4   : > { %1377 = vmatmul.mubr.msk.bf16.vlgmr.msra.gmra.mrb[0].mxu1 %vm729_vm2, %v1530_v47  ;;  %v1546_v47 = vld [vmem:[%s2262_s6 + $0x28] sm:$0xff] (!%p1270_p4)  }
 0x2b5   : > { %1402 = vmatprep.mubr.msk.bf16.mxu1 (!%p1270_p4), %vm1785_vm3, %v1784_v60  ;;  %1387 = vmatpush3.bf16.msra.mxu1 (!%p1270_p4), %v1533_v63 }
 0x2b6   : > { %1388 = vmatprep.subr.bf16.mxu1 (!%p1270_p4), %v1784_v60 }
 0x2b9   : > { %1389 = vmatpush3.bf16.msra.mxu1 (!%p1270_p4), %v1534_v0 }
 0x2ba   : > { %1390 = vmatprep.subr.bf16.mxu1 (!%p1270_p4), %v1784_v60 }
 0x2bd   : > { %1391 = vmatpush3.bf16.msra.mxu1 (!%p1270_p4), %v1535_v1 }
 0x2be   : > { %1392 = vmatprep.subr.bf16.mxu1 (!%p1270_p4), %v1784_v60 }
 0x2c1   : > { %1393 = vmatpush3.bf16.msra.mxu1 (!%p1270_p4), %v1536_v2 }
 0x2c2   : > { %1394 = vmatprep.subr.bf16.mxu1 (!%p1270_p4), %v1784_v60 }
 0x2c5   : > { %1395 = vmatpush3.bf16.msra.mxu1 (!%p1270_p4), %v1537_v3 }
 0x2c6   : > { %1396 = vmatprep.subr.bf16.mxu1 (!%p1270_p4), %v1784_v60 }
 0x2c9   : > { %1397 = vmatpush3.bf16.msra.mxu1 (!%p1270_p4), %v1538_v4 }
 0x2ca   : > { %1398 = vmatprep.subr.bf16.mxu1 (!%p1270_p4), %v1784_v60 }
 0x2cd   : > { %1399 = vmatpush3.bf16.msra.mxu1 (!%p1270_p4), %v1539_v5 }
 0x2ce   : > { %1400 = vmatprep.subr.bf16.mxu1 (!%p1270_p4), %v1784_v60 }
 0x2d1   : > { %1401 = vmatpush3.bf16.msra.mxu1 (!%p1270_p4), %v1540_v6 }
 0x387   : > { %v767_v50 = vpop.f32.mrb[0].mxu1 }
 0x388   : > { %v768_v51 = vadd.f32 %v767_v50, %v723_v49  ;;  %v1378_v52 = vpop.f32.mrb[1].mxu1  ;;  %781 = sbr.rel (%p1270_p4) target bundleno = 1966 (0x7ae), region = 84  ;;  %v1548_v50 = vld [vmem:[%s2262_s6 + $0x38] sm:$0xff] (!%p1270_p4)  }
 0x389   : > { %v770_v53 = vpop.f32.mrb[2].mxu1 }
 0x38a   : > { %v774_v54 = vmax.f32 %v768_v51, 0.0  ;;  %v771_v55 = vadd.f32 %v770_v53, %v723_v49  ;;  %v1379_v56 = vpop.f32.mrb[3].mxu1  ;;  %v1547_v49 = vld [vmem:[%s2262_s6 + $0x30] sm:$0xff] (!%p1270_p4)   ;;  %v886_v51 = vrot.slane (!%p1270_p4), %v2127_v35, %v722_v48 }
 0x38c   : > { %776 = vst [vmem:[#allocation2] sm:$0xff] %v774_v54  ;;  %v775_v57 = vmax.f32 %v771_v55, 0.0 }
 0x38e   : > { %777 = vst [vmem:[#allocation2 + $0x8] sm:$0xff] %v775_v57 }
 0x393   : > { %v784_v58 = vld [vmem:[#allocation2] sm:$0xff] }
 0x395   : > { %v785_v59 = vld [vmem:[#allocation2 + $0x8] sm:$0xff] }
 0x396   : > { %v786_v61 = vpack.c.bf16 %v785_v59, %v784_v58 }
 0x398   : > { %1381 = vmatpush3.bf16.msra.mxu0 %v786_v61 }
 0x399   : > { %1406 = vmatprep.subr.bf16.mxu0 %v1784_v60 }
 0x39b   : > { %1383 = vmatmul.mubr.msk.bf16.vlgmr.msra.gmra.mrb[0].mxu0 %vm729_vm2, %v783_v62 }
 0x39c   : > { %1422 = vmatprep.mubr.msk.bf16.mxu0 %vm1785_vm3, %v1784_v60  ;;  %1407 = vmatpush3.bf16.msra.mxu0 %v1541_v44 }
 0x39d   : > { %1408 = vmatprep.subr.bf16.mxu0 %v1784_v60 }
 0x3a0   : > { %1409 = vmatpush3.bf16.msra.mxu0 %v1542_v27 }
 0x3a1   : > { %1410 = vmatprep.subr.bf16.mxu0 %v1784_v60 }
 0x3a4   : > { %1411 = vmatpush3.bf16.msra.mxu0 %v1543_v31 }
 0x3a5   : > { %1412 = vmatprep.subr.bf16.mxu0 %v1784_v60 }
 0x3a8   : > { %1413 = vmatpush3.bf16.msra.mxu0 %v1544_v45 }
 0x3a9   : > { %1414 = vmatprep.subr.bf16.mxu0 %v1784_v60 }
 0x3ac   : > { %1415 = vmatpush3.bf16.msra.mxu0 %v1545_v46 }
 0x3ad   : > { %1416 = vmatprep.subr.bf16.mxu0 %v1784_v60 }
 0x3b0   : > { %1417 = vmatpush3.bf16.msra.mxu0 %v1546_v47 }
 0x3b1   : > { %1418 = vmatprep.subr.bf16.mxu0 %v1784_v60 }
 0x3b4   : > { %1419 = vmatpush3.bf16.msra.mxu0 %v1547_v49 }
 0x3b5   : > { %1420 = vmatprep.subr.bf16.mxu0 %v1784_v60 }
 0x3b8   : > { %1421 = vmatpush3.bf16.msra.mxu0 %v1548_v50 }
 0x46e   : > { %v824_v7 = vpop.f32.mrb[0].mxu0 }
 0x46f   : > { %v831_v8 = vsel %vm830_vm4, %v824_v7, 0.0  ;;  %v840_v9 = vmul.f32 %v824_v7, %v824_v7  ;;  %v1384_v10 = vpop.f32.mrb[1].mxu0 }
 0x470   : > { %v832_v11 = vrot.slane %v831_v8, 4  ;;  %v827_v12 = vpop.f32.mrb[2].mxu0 }
 0x471   : > { %v841_v13 = vsel %vm830_vm4, %v840_v9, 0.0  ;;  %v1385_v14 = vpop.f32.mrb[3].mxu0 }
 0x472   : > { %v833_v15 = vadd.f32 %v832_v11, %v831_v8  ;;  %v842_v16 = vrot.slane %v841_v13, 4  ;;  %v1002_v14 = vsub.s32 3, %v2091_v26 }
 0x474   : > { %v834_v17 = vrot.slane %v833_v15, 2  ;;  %v843_v18 = vadd.f32 %v842_v16, %v841_v13 }
 0x476   : > { %v835_v19 = vadd.f32 %v834_v17, %v833_v15  ;;  %v844_v20 = vrot.slane %v843_v18, 2  ;;  %v1007_v15 = vsub.s32 4, %v2091_v26  ;;  %v1003_v17 = vrot.slane %v2127_v35, %v1002_v14 }
 0x478   : > { %v836_v21 = vrot.slane %v835_v19, 1  ;;  %v845_v22 = vadd.f32 %v844_v20, %v843_v18  ;;  %v1008_v20 = vrot.slane %v2127_v35, %v1007_v15 }
 0x47a   : > { %v837_v23 = vadd.f32 %v836_v21, %v835_v19  ;;  %v846_v24 = vrot.slane %v845_v22, 1 }
 0x47c   : > { %v839_v25 = vmul.f32 0.5, %v837_v23  ;;  %v847_v28 = vadd.f32 %v846_v24, %v845_v22  ;;  %v1029_v24 = vsub.s32 5, %v2091_v26 }
 0x47e   : > { %v848_v29 = vmul.f32 0.5, %v847_v28  ;;  %v849_v30 = vmul.f32 %v839_v25, %v839_v25  ;;  %v852_v36 = vsub.f32 %v824_v7, %v839_v25  ;;  %v1030_v25 = vrot.slane %v2127_v35, %v1029_v24 }
 0x480   : > { %v850_v32 = vsub.f32 %v848_v29, %v849_v30 }
 0x482   : > { %v851_v33 = vmax.f32 %v850_v32, 0.0 }
 0x484   : > { %v853_v34 = vadd.f32 1e-05, %v851_v33 }
 0x486   : > { %1549 = vrsqrt.f32 %v853_v34 }
 0x490   : > { %v1550_v38 = vpop.eup %1549 }
 0x491   : > { %v855_v39 = vmul.f32 %v1550_v38, %v852_v36 }
 0x493   : > { %v860_v41 = vmul.f32 %v859_v37, %v855_v39 }
 0x495   : > { %v865_v42 = vadd.f32 %v864_v40, %v860_v41 }
 0x497   : > { %v866_v43 = vpack.c.bf16 %v865_v42, %v865_v42 }
 0x499   : > { %1403 = vmatmul.mubr.bf16.vlgmr.msra.gmra.mrb[0].mxu1 %v866_v43 }
 0x56c   : > { %v969_v52 = vpop.f32.mrb[0].mxu1 }
 0x56d   : > { %v970_v53 = vadd.f32 %v969_v52, %v886_v51  ;;  %v1404_v54 = vpop.f32.mrb[1].mxu1 }
 0x56e   : > { %v972_v55 = vpop.f32.mrb[2].mxu1 }
 0x56f   : > { %v975_v56 = vmax.f32 %v970_v53, 0.0  ;;  %v1405_v57 = vpop.f32.mrb[3].mxu1 }
 0x571   : > { %v976_v58 = vsel %vm830_vm4, %v975_v56, 0.0  ;;  %v984_v59 = vmul.f32 %v975_v56, %v975_v56 }
 0x572   : > { %v977_v61 = vrot.slane %v976_v58, 4 }
 0x573   : > { %v985_v60 = vsel %vm830_vm4, %v984_v59, 0.0 }
 0x574   : > { %v978_v62 = vadd.f32 %v977_v61, %v976_v58  ;;  %v986_v63 = vrot.slane %v985_v60, 4 }
 0x576   : > { %v979_v0 = vrot.slane %v978_v62, 2  ;;  %v987_v1 = vadd.f32 %v986_v63, %v985_v60 }
 0x578   : > { %v980_v2 = vadd.f32 %v979_v0, %v978_v62  ;;  %v988_v3 = vrot.slane %v987_v1, 2 }
 0x57a   : > { %v981_v4 = vrot.slane %v980_v2, 1  ;;  %v989_v48 = vadd.f32 %v988_v3, %v987_v1 }
 0x57c   : > { %v982_v5 = vadd.f32 %v981_v4, %v980_v2  ;;  %v990_v6 = vrot.slane %v989_v48, 1 }
 0x57e   : > { %v983_v7 = vmul.f32 0.5, %v982_v5  ;;  %v991_v8 = vadd.f32 %v990_v6, %v989_v48 }
 0x580   : > { %v992_v9 = vmul.f32 0.5, %v991_v8  ;;  %v993_v10 = vmul.f32 %v983_v7, %v983_v7  ;;  %v996_v16 = vsub.f32 %v975_v56, %v983_v7 }
 0x582   : > { %v994_v11 = vsub.f32 %v992_v9, %v993_v10 }
 0x584   : > { %v995_v12 = vmax.f32 %v994_v11, 0.0 }
 0x586   : > { %v997_v13 = vadd.f32 1e-05, %v995_v12 }
 0x588   : > { %1551 = vrsqrt.f32 %v997_v13 }
 0x592   : > { %v1552_v18 = vpop.eup %1551 }
 0x593   : > { %v999_v19 = vmul.f32 %v1552_v18, %v996_v16 }
 0x595   : > { %v1004_v21 = vmul.f32 %v1003_v17, %v999_v19 }
 0x597   : > { %v1009_v22 = vadd.f32 %v1008_v20, %v1004_v21 }
 0x599   : > { %v1010_v23 = vpack.c.bf16 %v1009_v22, %v1009_v22 }
 0x59b   : > { %1423 = vmatmul.mubr.bf16.vlgmr.msra.gmra.mrb[4].mxu0 %v1010_v23 }
 0x66e   : > { %v1113_v28 = vpop.f32.mrb[4].mxu0 }
 0x66f   : > { %v1114_v29 = vadd.f32 %v1113_v28, %v1030_v25  ;;  %v1424_v30 = vpop.f32.mrb[5].mxu0 }
 0x670   : > { %v1116_v32 = vpop.f32.mrb[6].mxu0 }
 0x671   : > { %v1425_v33 = vpop.f32.mrb[7].mxu0  ;;  %v1120_v34 = vsel %vm1119_vm5, %v1114_v29, -inf }
 0x672   : > { %1121 = vmax.xlane.f32.xlu0 %v1120_v34 }
 0x6ff   : > { %v1122_v36 = vpop.xlane.xlu0 %1121 }
 0x700   : > { %v1123_v37 = vsub.f32 %v1114_v29, %v1122_v36 }
 0x702   : > { %v1124_v38 = vmul.f32 1.442695, %v1123_v37 }
 0x704   : > { %1553 = vpow2.f32 %v1124_v38 }
 0x70e   : > { %v1554_v39 = vpop.eup %1553 }
 0x70f   : > { %v1126_v40 = vsel %vm1119_vm5, %v1554_v39, 0.0 }
 0x710   : > { %1127 = vadd.xlane.f32.xlu0 %v1126_v40 }
 0x79d   : > { %v1128_v26 = vpop.xlane.xlu0 %1127 }
 0x79e   : > { %1555 = vlog2.f32 %v1128_v26 }
 0x7a8   : > { %v1556_v35 = vpop.eup %1555 }
 0x7a9   : > { %v1130_v41 = vmul.f32 0.6931472, %v1556_v35 }
 0x7ab   : > { %v1131_v42 = vsub.f32 %v1123_v37, %v1130_v41 }
 0x7ad   : > { %1132 = vst.msk [vmem:[#allocation11] sm:$0x3] %vm1119_vm5, %v1131_v42 }
 0x7ae PF: > { %p1465_p2 = scmp.eq.s32.totalorder %s1861_s17, 2  ;;  %s1786_s26 = smov [#allocation11]  }
 0x7af   : > { %s1140_s19 = sshll.u32 %s1786_s26, 4  ;;  %s1141_s19 = int_to_ptr.vmem [resolvable:$true] %s1140_s19 }
 0x7b0   : > { %s1693_s7 = scalar_lea.vmem %s1141_s19, 32  ;;  %p1700_p13 = scmp.lt.s32.totalorder %s1141_s19, %s1141_s19 }
 0x7b1   : > { %p1694_p6 = scmp.ne.s32.totalorder %s1141_s19, %s1693_s7  ;;  %p1701_p12 = scmp.lt.s32.totalorder %s1693_s7, %s1693_s7 }
 0x7b3   : > { %p1695_p7 = pnand %p1694_p6, %p1465_p2  ;;  %p1702_p8 = por %p1701_p12, %p1700_p13 }
 0x7b5   : > { %p1696_p11 = pneg %p1695_p7 }
 0x7b7   : > { %p1703_p10 = pnand %p1702_p8, %p1696_p11 }
 0x7b9   : > { %1706 = shalt.err (!%p1703_p10)
}
 0x7ba   : > { %s2263_s24 = sld [smem:[#allocation28_spill]] }
 0x7c0   : > { %s1707_s10 = scalar_lea.hbm %s2263_s24, 32 }
 0x7c1   : > { %p1708_p0 = scmp.ne.s32.totalorder %s2263_s24, %s1707_s10  ;;  %p1713_p1 = scmp.lt.u32.totalorder %s1707_s10, %s2263_s24 }
 0x7c3   : > { %p1709_p5 = pnand %p1708_p0, %p1465_p2 }
 0x7c5   : > { %p1710_p9 = pneg %p1709_p5 }
 0x7c7   : > { %p1715_p3 = pnand %p1713_p1, %p1710_p9 }
 0x7c9   : > { %1718 = shalt.err (!%p1715_p3)
}
 0x7ca   : > { %1441 = dma.vmem_to_hbm [thread:$0]  (%p1465_p2), %s1141_s19, 32, %s2263_s24, [#allocation6]  }
 0x7cb   : > { %1754 = dma.done.wait (%p1465_p2), [#allocation6], 32  }
 0x7cc   : > { %1756 = vsyncadd (%p1465_p2), [#allocation6], 4294967264 }
 0x7cd PF: > { %s2264_s16 = sld [smem:[#allocation22_spill]]  ;;  %s2265_s25 = sld [smem:[#allocation23_spill]] }
 0x7ce   : > { %s2266_s13 = smov %s1763_s14  ;;  %s2267_s14 = smov %s1767_s15 }
 0x7d3   : > { %p20_p4 = scmp.ge.s32.totalorder %s2264_s16, 5   ;;  %s2268_s15 = smov %s2265_s25 }
 0x7d5   :  { %22 = sbr.rel (!%p20_p4) target bundleno = 10 (0xa), region = 119 }
 0x7dc   :  { %1153 = vsyncpa [#allocation5], 1 }
 0x7dd   :  { %1155 = vsyncpa [#allocation5 + $0x1], 1 }
 0x7de   :  { %1156 = vsyncpa [#allocation8], 1 }
 0x7df   :  { %1157 = vsyncpa [#allocation6], 1 }
 0x7e0   :  { %1159 = vsyncpa [#allocation6 + $0x1], 1 }
 0x7e1   :  { %1160 = vsyncmov [#allocation3] }
 0x7e4   :  { %s1161_s17 = vpop.sfrf %1160 }
 0x7e5   :  { %p1292_p2 = scmp.ne.s32.totalorder %s1161_s17, 0 }
 0x7e7   :  { %1165 = shalt.err (%p1292_p2)  }

</bundles_post_ra>
